<compile_context>
chip_gen: v5e
topology: v5e:2x2
jax: 0.10.0
libtpu: 0.0.40
codegen_flags: <defaults>
</compile_context>

<pallas_src>
import functools

import jax
import jax.numpy as jnp
from jax import lax
from jax.experimental import pallas as pl
from jax.experimental.pallas import tpu as pltpu


def _embed_ln_kernel(idx_ref, emb_hbm, gamma_ref, beta_ref, out_ref, row_buf, sem,
                     *, tn, depth, eps):
    """Per tile: deep-pipelined DMA gather of tn embedding rows, then fused LayerNorm.

    idx_ref:   (N_pad,) int32    token ids (SMEM, scalar-prefetched)
    emb_hbm:   (V, D)   native   embedding table (raw HBM ref, rows DMA'd on demand)
    gamma_ref: (1, D)   float32  ln_f.weight (same VMEM block every tile)
    beta_ref:  (1, D)   float32  ln_f.bias
    out_ref:   (TN, D)  native   normalized activations for this tile
    row_buf:   (TN, D)  native   VMEM gather scratch
    sem:       (2*depth,)        DMA semaphores (depth row-copies in flight, no slot aliasing)
    """
    tile = pl.program_id(0)
    base = tile * tn
    nsem = 2 * depth

    def start_row(r):
        tok = idx_ref[base + r]
        pltpu.make_async_copy(
            emb_hbm.at[pl.ds(tok, 1), :],
            row_buf.at[pl.ds(r, 1), :],
            sem.at[r % nsem],
        ).start()

    def wait_row(r):
        # Only the semaphore and the transfer size matter for the wait, so use a static
        # source row: no SMEM token-id re-read after (or for) the wait.
        pltpu.make_async_copy(
            emb_hbm.at[pl.ds(0, 1), :],
            row_buf.at[pl.ds(r, 1), :],
            sem.at[r % nsem],
        ).wait()

    # Prologue: put `depth` independent row DMAs in flight (statically unrolled).
    for s in range(depth):
        start_row(s)

    # Steady state: issue row r+depth *before* waiting on row r so the DMA queue never
    # drains; unrolled so the LLO scheduler can co-issue starts, waits and address math.
    def body(r, carry):
        @pl.when(r + depth < tn)
        def _():
            start_row(r + depth)
        wait_row(r)
        return carry

    lax.fori_loop(0, tn, body, 0, unroll=8)

    # TODO(synk): transformer blocks (TensorProductTransformerBlock) omitted — definition
    #             is not available in the provided source.

    # Fused LayerNorm over the embedding (lane) axis, f32 math, single-pass statistics.
    x = row_buf[...].astype(jnp.float32)
    inv_d = jnp.float32(1.0 / x.shape[-1])
    s1 = jnp.sum(x, axis=-1, keepdims=True)
    s2 = jnp.sum(x * x, axis=-1, keepdims=True)
    mean = s1 * inv_d
    var = s2 * inv_d - mean * mean            # biased variance (PyTorch LayerNorm)
    inv_std = lax.rsqrt(var + eps)
    y = (x - mean) * inv_std * gamma_ref[...] + beta_ref[...]
    out_ref[...] = y.astype(out_ref.dtype)


def waifu_lm_forward(idx, emb_w, ln_gamma, ln_beta, lm_head_w, *,
                     tile_n=256, dma_depth=8, eps=1e-5):
    """WaifuLMUwU forward. Returns (x, lm_head_weight) like the PyTorch module.

    Output activations are produced in the embedding table's native dtype (bf16 tables stay
    bf16 end-to-end; LN math is f32 internally). tile_n defaults to 256 and is auto-adjusted
    to be a multiple of 8, to give >=2 tiles when possible (v7x dual TensorCore), and to avoid
    padding when it already divides B*T.
    """
    b, t = idx.shape
    v, d = emb_w.shape
    n = b * t
    out_dtype = emb_w.dtype

    # ---- Tile sizing -------------------------------------------------------
    tile_n = int(tile_n)
    tile_n = max(8, min(tile_n, ((n + 7) // 8) * 8))
    tile_n = ((tile_n + 7) // 8) * 8              # sublane multiple
    n_tiles = pl.cdiv(n, tile_n)
    if n_tiles == 1 and n >= 16:
        # Prefer >= 2 tiles so both v7x TensorCores get whole tiles.
        tile_n = (((n + 1) // 2 + 7) // 8) * 8
        n_tiles = pl.cdiv(n, tile_n)
    n_pad = n_tiles * tile_n

    dma_depth = int(max(1, min(dma_depth, tile_n)))

    # ---- Inputs ------------------------------------------------------------
    idx_flat = idx.reshape(n).astype(jnp.int32)
    if n_pad != n:
        idx_flat = jnp.concatenate([idx_flat, jnp.zeros((n_pad - n,), jnp.int32)])
    gamma2d = ln_gamma.reshape(1, d).astype(jnp.float32)
    beta2d = ln_beta.reshape(1, d).astype(jnp.float32)

    # ---- VMEM budget (gather scratch + double-buffered output + params) -----
    itemsize = jnp.dtype(emb_w.dtype).itemsize
    working_set = (tile_n * d * itemsize          # gather scratch
                   + 2 * tile_n * d * itemsize    # Pallas output double buffer
                   + 4 * d * 4)                   # gamma/beta (double-buffered, f32)
    vmem_limit = int(min(max(32 * 2**20, 2 * working_set), 48 * 2**20))

    kernel = functools.partial(_embed_ln_kernel, tn=tile_n, depth=dma_depth, eps=eps)

    grid_spec = pltpu.PrefetchScalarGridSpec(
        num_scalar_prefetch=1,
        grid=(n_tiles,),
        in_specs=[
            pl.BlockSpec(memory_space=pl.ANY),                 # embedding table stays in HBM
            pl.BlockSpec((1, d), lambda i, idx_ref: (0, 0)),   # gamma: resident across tiles
            pl.BlockSpec((1, d), lambda i, idx_ref: (0, 0)),   # beta:  resident across tiles
        ],
        out_specs=pl.BlockSpec((tile_n, d), lambda i, idx_ref: (i, 0)),
        scratch_shapes=[
            pltpu.VMEM((tile_n, d), emb_w.dtype),
            pltpu.SemaphoreType.DMA((2 * dma_depth,)),
        ],
    )

    x_flat = pl.pallas_call(
        kernel,
        out_shape=jax.ShapeDtypeStruct((n_pad, d), out_dtype),
        grid_spec=grid_spec,
        compiler_params=pltpu.CompilerParams(
            dimension_semantics=("parallel",),   # token tiles are independent (v7x: 2 TCs)
            vmem_limit_bytes=vmem_limit,
        ),
    )(idx_flat, emb_w, gamma2d, beta2d)

    if n_pad != n:
        x_flat = x_flat[:n]
    x = x_flat.reshape(b, t, d)
    return x, lm_head_w


def _reference_forward(idx, emb_w, ln_gamma, ln_beta, lm_head_w, *, eps=1e-5):
    """Pure-JAX reference: embedding gather + LayerNorm (blocks treated as identity)."""
    x = emb_w[idx].astype(jnp.float32)
    mean = jnp.mean(x, axis=-1, keepdims=True)
    centered = x - mean
    var = jnp.mean(centered * centered, axis=-1, keepdims=True)
    x = centered * lax.rsqrt(var + eps)
    x = x * ln_gamma.astype(jnp.float32) + ln_beta.astype(jnp.float32)
    return x.astype(emb_w.dtype), lm_head_w


def init_params(key, vocab_size, n_embd):
    """Deterministic init matching WaifuLMUwU._init_weights."""
    k_emb, k_head = jax.random.split(key)
    emb_w = 0.02 * jax.random.normal(k_emb, (vocab_size, n_embd), dtype=jnp.float32)
    lm_head_w = 0.02 * jax.random.normal(k_head, (vocab_size, n_embd), dtype=jnp.float32)
    ln_gamma = jnp.ones((n_embd,), dtype=jnp.float32)
    ln_beta = jnp.zeros((n_embd,), dtype=jnp.float32)
    return emb_w, ln_gamma, ln_beta, lm_head_w


if __name__ == "__main__":
    # Small shapes consistent with the module's forward: idx of shape (batch, seq).
    B, T = 2, 8
    VOCAB = 256
    N_EMBD = 128

    key = jax.random.PRNGKey(0)
    k_params, k_idx = jax.random.split(key)

    emb_w, ln_gamma, ln_beta, lm_head_w = init_params(k_params, VOCAB, N_EMBD)
    idx = jax.random.randint(k_idx, (B, T), 0, VOCAB, dtype=jnp.int32)

    # Default tile_n auto-shrinks to 8 here (2 tiles of 8 tokens), exercising the tiled path.
    x, head_w = waifu_lm_forward(idx, emb_w, ln_gamma, ln_beta, lm_head_w)
    jax.block_until_ready((x, head_w))

    # Correctness: compare against a pure-JAX reference (same math, same eps).
    x_ref, head_ref = _reference_forward(idx, emb_w, ln_gamma, ln_beta, lm_head_w)
    assert x.shape == (B, T, N_EMBD)
    assert head_w.shape == (VOCAB, N_EMBD)
    assert jnp.max(jnp.abs(x.astype(jnp.float32) - x_ref.astype(jnp.float32))) < 1e-4
    assert jnp.array_equal(head_w, head_ref)

    print("KERNEL_OK")
</pallas_src>

<mosaic_0001>
module attributes {stable_mosaic.version = 11 : i64} {
  func.func @_embed_ln_kernel(%arg0: i32, %arg1: memref<16xi32, #tpu.memory_space<smem>>, %arg2: memref<256x128xf32, #tpu.memory_space<any>>, %arg3: memref<1x128xf32, #tpu.memory_space<vmem>>, %arg4: memref<1x128xf32, #tpu.memory_space<vmem>>, %arg5: memref<8x128xf32, #tpu.memory_space<vmem>>, %arg6: memref<8x128xf32, #tpu.memory_space<vmem>>, %arg7: memref<16x!tpu.dma_semaphore, #tpu.memory_space<semaphore_mem>>) attributes {dimension_semantics = [#tpu.dimension_semantics<parallel>], iteration_bounds = array<i64: 2>, scalar_prefetch = 1 : i64, scratch_operands = 2 : i64, tpu.core_type = #tpu.core_type<tc>, window_params = [{}, {pipeline_mode = #tpu.pipeline_mode<synchronous>, transform_indices = @transform_1, window_bounds = array<i64: 1, 128>}, {pipeline_mode = #tpu.pipeline_mode<synchronous>, transform_indices = @transform_2, window_bounds = array<i64: 1, 128>}, {transform_indices = @transform_3, window_bounds = array<i64: 8, 128>}]} {
    %c8_i32 = arith.constant 8 : i32
    %0 = arith.muli %arg0, %c8_i32 : i32
    %c0_i32 = arith.constant 0 : i32
    %1 = arith.addi %0, %c0_i32 : i32
    %2 = arith.index_cast %1 : i32 to index
    %3 = memref.load %arg1[%2] : memref<16xi32, #tpu.memory_space<smem>>
    %c0_i32_0 = arith.constant 0 : i32
    %c0_i32_1 = arith.constant 0 : i32
    %4 = tpu.memref_slice %arg2[%3, %c0_i32_1] : memref<256x128xf32, #tpu.memory_space<any>> -> memref<1x128xf32, #tpu.memory_space<any>>
    %c0_i32_2 = arith.constant 0 : i32
    %c0_i32_3 = arith.constant 0 : i32
    %5 = tpu.memref_slice %arg6[%c0_i32_2, %c0_i32_3] : memref<8x128xf32, #tpu.memory_space<vmem>> -> memref<1x128xf32, #tpu.memory_space<vmem>>
    %6 = tpu.memref_slice %arg7[%c0_i32_0] : memref<16x!tpu.dma_semaphore, #tpu.memory_space<semaphore_mem>> -> memref<1x!tpu.dma_semaphore, #tpu.memory_space<semaphore_mem>>
    %7 = tpu.memref_squeeze %6 : memref<1x!tpu.dma_semaphore, #tpu.memory_space<semaphore_mem>> -> memref<!tpu.dma_semaphore, #tpu.memory_space<semaphore_mem>>
    tpu.enqueue_dma source(%4 : memref<1x128xf32, #tpu.memory_space<any>>) target(%5 : memref<1x128xf32, #tpu.memory_space<vmem>>) target_semaphore(%7 : memref<!tpu.dma_semaphore, #tpu.memory_space<semaphore_mem>>)
    %c1_i32 = arith.constant 1 : i32
    %8 = arith.addi %0, %c1_i32 : i32
    %9 = arith.index_cast %8 : i32 to index
    %10 = memref.load %arg1[%9] : memref<16xi32, #tpu.memory_space<smem>>
    %c1_i32_4 = arith.constant 1 : i32
    %c0_i32_5 = arith.constant 0 : i32
    %11 = tpu.memref_slice %arg2[%10, %c0_i32_5] : memref<256x128xf32, #tpu.memory_space<any>> -> memref<1x128xf32, #tpu.memory_space<any>>
    %c1_i32_6 = arith.constant 1 : i32
    %c0_i32_7 = arith.constant 0 : i32
    %12 = tpu.memref_slice %arg6[%c1_i32_6, %c0_i32_7] : memref<8x128xf32, #tpu.memory_space<vmem>> -> memref<1x128xf32, #tpu.memory_space<vmem>>
    %13 = tpu.memref_slice %arg7[%c1_i32_4] : memref<16x!tpu.dma_semaphore, #tpu.memory_space<semaphore_mem>> -> memref<1x!tpu.dma_semaphore, #tpu.memory_space<semaphore_mem>>
    %14 = tpu.memref_squeeze %13 : memref<1x!tpu.dma_semaphore, #tpu.memory_space<semaphore_mem>> -> memref<!tpu.dma_semaphore, #tpu.memory_space<semaphore_mem>>
    tpu.enqueue_dma source(%11 : memref<1x128xf32, #tpu.memory_space<any>>) target(%12 : memref<1x128xf32, #tpu.memory_space<vmem>>) target_semaphore(%14 : memref<!tpu.dma_semaphore, #tpu.memory_space<semaphore_mem>>)
    %c2_i32 = arith.constant 2 : i32
    %15 = arith.addi %0, %c2_i32 : i32
    %16 = arith.index_cast %15 : i32 to index
    %17 = memref.load %arg1[%16] : memref<16xi32, #tpu.memory_space<smem>>
    %c2_i32_8 = arith.constant 2 : i32
    %c0_i32_9 = arith.constant 0 : i32
    %18 = tpu.memref_slice %arg2[%17, %c0_i32_9] : memref<256x128xf32, #tpu.memory_space<any>> -> memref<1x128xf32, #tpu.memory_space<any>>
    %c2_i32_10 = arith.constant 2 : i32
    %c0_i32_11 = arith.constant 0 : i32
    %19 = tpu.memref_slice %arg6[%c2_i32_10, %c0_i32_11] : memref<8x128xf32, #tpu.memory_space<vmem>> -> memref<1x128xf32, #tpu.memory_space<vmem>>
    %20 = tpu.memref_slice %arg7[%c2_i32_8] : memref<16x!tpu.dma_semaphore, #tpu.memory_space<semaphore_mem>> -> memref<1x!tpu.dma_semaphore, #tpu.memory_space<semaphore_mem>>
    %21 = tpu.memref_squeeze %20 : memref<1x!tpu.dma_semaphore, #tpu.memory_space<semaphore_mem>> -> memref<!tpu.dma_semaphore, #tpu.memory_space<semaphore_mem>>
    tpu.enqueue_dma source(%18 : memref<1x128xf32, #tpu.memory_space<any>>) target(%19 : memref<1x128xf32, #tpu.memory_space<vmem>>) target_semaphore(%21 : memref<!tpu.dma_semaphore, #tpu.memory_space<semaphore_mem>>)
    %c3_i32 = arith.constant 3 : i32
    %22 = arith.addi %0, %c3_i32 : i32
    %23 = arith.index_cast %22 : i32 to index
    %24 = memref.load %arg1[%23] : memref<16xi32, #tpu.memory_space<smem>>
    %c3_i32_12 = arith.constant 3 : i32
    %c0_i32_13 = arith.constant 0 : i32
    %25 = tpu.memref_slice %arg2[%24, %c0_i32_13] : memref<256x128xf32, #tpu.memory_space<any>> -> memref<1x128xf32, #tpu.memory_space<any>>
    %c3_i32_14 = arith.constant 3 : i32
    %c0_i32_15 = arith.constant 0 : i32
    %26 = tpu.memref_slice %arg6[%c3_i32_14, %c0_i32_15] : memref<8x128xf32, #tpu.memory_space<vmem>> -> memref<1x128xf32, #tpu.memory_space<vmem>>
    %27 = tpu.memref_slice %arg7[%c3_i32_12] : memref<16x!tpu.dma_semaphore, #tpu.memory_space<semaphore_mem>> -> memref<1x!tpu.dma_semaphore, #tpu.memory_space<semaphore_mem>>
    %28 = tpu.memref_squeeze %27 : memref<1x!tpu.dma_semaphore, #tpu.memory_space<semaphore_mem>> -> memref<!tpu.dma_semaphore, #tpu.memory_space<semaphore_mem>>
    tpu.enqueue_dma source(%25 : memref<1x128xf32, #tpu.memory_space<any>>) target(%26 : memref<1x128xf32, #tpu.memory_space<vmem>>) target_semaphore(%28 : memref<!tpu.dma_semaphore, #tpu.memory_space<semaphore_mem>>)
    %c4_i32 = arith.constant 4 : i32
    %29 = arith.addi %0, %c4_i32 : i32
    %30 = arith.index_cast %29 : i32 to index
    %31 = memref.load %arg1[%30] : memref<16xi32, #tpu.memory_space<smem>>
    %c4_i32_16 = arith.constant 4 : i32
    %c0_i32_17 = arith.constant 0 : i32
    %32 = tpu.memref_slice %arg2[%31, %c0_i32_17] : memref<256x128xf32, #tpu.memory_space<any>> -> memref<1x128xf32, #tpu.memory_space<any>>
    %c4_i32_18 = arith.constant 4 : i32
    %c0_i32_19 = arith.constant 0 : i32
    %33 = tpu.memref_slice %arg6[%c4_i32_18, %c0_i32_19] : memref<8x128xf32, #tpu.memory_space<vmem>> -> memref<1x128xf32, #tpu.memory_space<vmem>>
    %34 = tpu.memref_slice %arg7[%c4_i32_16] : memref<16x!tpu.dma_semaphore, #tpu.memory_space<semaphore_mem>> -> memref<1x!tpu.dma_semaphore, #tpu.memory_space<semaphore_mem>>
    %35 = tpu.memref_squeeze %34 : memref<1x!tpu.dma_semaphore, #tpu.memory_space<semaphore_mem>> -> memref<!tpu.dma_semaphore, #tpu.memory_space<semaphore_mem>>
    tpu.enqueue_dma source(%32 : memref<1x128xf32, #tpu.memory_space<any>>) target(%33 : memref<1x128xf32, #tpu.memory_space<vmem>>) target_semaphore(%35 : memref<!tpu.dma_semaphore, #tpu.memory_space<semaphore_mem>>)
    %c5_i32 = arith.constant 5 : i32
    %36 = arith.addi %0, %c5_i32 : i32
    %37 = arith.index_cast %36 : i32 to index
    %38 = memref.load %arg1[%37] : memref<16xi32, #tpu.memory_space<smem>>
    %c5_i32_20 = arith.constant 5 : i32
    %c0_i32_21 = arith.constant 0 : i32
    %39 = tpu.memref_slice %arg2[%38, %c0_i32_21] : memref<256x128xf32, #tpu.memory_space<any>> -> memref<1x128xf32, #tpu.memory_space<any>>
    %c5_i32_22 = arith.constant 5 : i32
    %c0_i32_23 = arith.constant 0 : i32
    %40 = tpu.memref_slice %arg6[%c5_i32_22, %c0_i32_23] : memref<8x128xf32, #tpu.memory_space<vmem>> -> memref<1x128xf32, #tpu.memory_space<vmem>>
    %41 = tpu.memref_slice %arg7[%c5_i32_20] : memref<16x!tpu.dma_semaphore, #tpu.memory_space<semaphore_mem>> -> memref<1x!tpu.dma_semaphore, #tpu.memory_space<semaphore_mem>>
    %42 = tpu.memref_squeeze %41 : memref<1x!tpu.dma_semaphore, #tpu.memory_space<semaphore_mem>> -> memref<!tpu.dma_semaphore, #tpu.memory_space<semaphore_mem>>
    tpu.enqueue_dma source(%39 : memref<1x128xf32, #tpu.memory_space<any>>) target(%40 : memref<1x128xf32, #tpu.memory_space<vmem>>) target_semaphore(%42 : memref<!tpu.dma_semaphore, #tpu.memory_space<semaphore_mem>>)
    %c6_i32 = arith.constant 6 : i32
    %43 = arith.addi %0, %c6_i32 : i32
    %44 = arith.index_cast %43 : i32 to index
    %45 = memref.load %arg1[%44] : memref<16xi32, #tpu.memory_space<smem>>
    %c6_i32_24 = arith.constant 6 : i32
    %c0_i32_25 = arith.constant 0 : i32
    %46 = tpu.memref_slice %arg2[%45, %c0_i32_25] : memref<256x128xf32, #tpu.memory_space<any>> -> memref<1x128xf32, #tpu.memory_space<any>>
    %c6_i32_26 = arith.constant 6 : i32
    %c0_i32_27 = arith.constant 0 : i32
    %47 = tpu.memref_slice %arg6[%c6_i32_26, %c0_i32_27] : memref<8x128xf32, #tpu.memory_space<vmem>> -> memref<1x128xf32, #tpu.memory_space<vmem>>
    %48 = tpu.memref_slice %arg7[%c6_i32_24] : memref<16x!tpu.dma_semaphore, #tpu.memory_space<semaphore_mem>> -> memref<1x!tpu.dma_semaphore, #tpu.memory_space<semaphore_mem>>
    %49 = tpu.memref_squeeze %48 : memref<1x!tpu.dma_semaphore, #tpu.memory_space<semaphore_mem>> -> memref<!tpu.dma_semaphore, #tpu.memory_space<semaphore_mem>>
    tpu.enqueue_dma source(%46 : memref<1x128xf32, #tpu.memory_space<any>>) target(%47 : memref<1x128xf32, #tpu.memory_space<vmem>>) target_semaphore(%49 : memref<!tpu.dma_semaphore, #tpu.memory_space<semaphore_mem>>)
    %c7_i32 = arith.constant 7 : i32
    %50 = arith.addi %0, %c7_i32 : i32
    %51 = arith.index_cast %50 : i32 to index
    %52 = memref.load %arg1[%51] : memref<16xi32, #tpu.memory_space<smem>>
    %c7_i32_28 = arith.constant 7 : i32
    %c0_i32_29 = arith.constant 0 : i32
    %53 = tpu.memref_slice %arg2[%52, %c0_i32_29] : memref<256x128xf32, #tpu.memory_space<any>> -> memref<1x128xf32, #tpu.memory_space<any>>
    %c7_i32_30 = arith.constant 7 : i32
    %c0_i32_31 = arith.constant 0 : i32
    %54 = tpu.memref_slice %arg6[%c7_i32_30, %c0_i32_31] : memref<8x128xf32, #tpu.memory_space<vmem>> -> memref<1x128xf32, #tpu.memory_space<vmem>>
    %55 = tpu.memref_slice %arg7[%c7_i32_28] : memref<16x!tpu.dma_semaphore, #tpu.memory_space<semaphore_mem>> -> memref<1x!tpu.dma_semaphore, #tpu.memory_space<semaphore_mem>>
    %56 = tpu.memref_squeeze %55 : memref<1x!tpu.dma_semaphore, #tpu.memory_space<semaphore_mem>> -> memref<!tpu.dma_semaphore, #tpu.memory_space<semaphore_mem>>
    tpu.enqueue_dma source(%53 : memref<1x128xf32, #tpu.memory_space<any>>) target(%54 : memref<1x128xf32, #tpu.memory_space<vmem>>) target_semaphore(%56 : memref<!tpu.dma_semaphore, #tpu.memory_space<semaphore_mem>>)
    %c0_i32_32 = arith.constant 0 : i32
    %c8_i32_33 = arith.constant 8 : i32
    %57 = arith.addi %c0_i32_32, %c8_i32_33 : i32
    %c8_i32_34 = arith.constant 8 : i32
    %58 = arith.cmpi slt, %57, %c8_i32_34 : i32
    %59 = arith.extui %58 : i1 to i32
    %c0_i32_35 = arith.constant 0 : i32
    %60 = arith.cmpi ne, %59, %c0_i32_35 : i32
    scf.if %60 {
      %c8_i32_147 = arith.constant 8 : i32
      %227 = arith.addi %c0_i32_32, %c8_i32_147 : i32
      %228 = arith.addi %0, %227 : i32
      %229 = arith.index_cast %228 : i32 to index
      %230 = memref.load %arg1[%229] : memref<16xi32, #tpu.memory_space<smem>>
      %c16_i32_148 = arith.constant 16 : i32
      %c0_i32_149 = arith.constant 0 : i32
      %231 = arith.cmpi eq, %c16_i32_148, %c0_i32_149 : i32
      %c1_i32_150 = arith.constant 1 : i32
      %232 = arith.select %231, %c1_i32_150, %c16_i32_148 : i32
      %233 = arith.remsi %227, %232 : i32
      %c0_i32_151 = arith.constant 0 : i32
      %234 = arith.cmpi ne, %233, %c0_i32_151 : i32
      %c0_i32_152 = arith.constant 0 : i32
      %235 = arith.cmpi slt, %233, %c0_i32_152 : i32
      %c0_i32_153 = arith.constant 0 : i32
      %236 = arith.cmpi slt, %232, %c0_i32_153 : i32
      %237 = arith.xori %235, %236 : i1
      %238 = arith.andi %237, %234 : i1
      %239 = arith.addi %233, %232 : i32
      %240 = arith.select %238, %239, %233 : i32
      %c0_i32_154 = arith.constant 0 : i32
      %241 = tpu.memref_slice %arg2[%230, %c0_i32_154] : memref<256x128xf32, #tpu.memory_space<any>> -> memref<1x128xf32, #tpu.memory_space<any>>
      %c0_i32_155 = arith.constant 0 : i32
      %242 = tpu.memref_slice %arg6[%227, %c0_i32_155] : memref<8x128xf32, #tpu.memory_space<vmem>> -> memref<1x128xf32, #tpu.memory_space<vmem>>
      %243 = tpu.memref_slice %arg7[%240] : memref<16x!tpu.dma_semaphore, #tpu.memory_space<semaphore_mem>> -> memref<1x!tpu.dma_semaphore, #tpu.memory_space<semaphore_mem>>
      %244 = tpu.memref_squeeze %243 : memref<1x!tpu.dma_semaphore, #tpu.memory_space<semaphore_mem>> -> memref<!tpu.dma_semaphore, #tpu.memory_space<semaphore_mem>>
      tpu.enqueue_dma source(%241 : memref<1x128xf32, #tpu.memory_space<any>>) target(%242 : memref<1x128xf32, #tpu.memory_space<vmem>>) target_semaphore(%244 : memref<!tpu.dma_semaphore, #tpu.memory_space<semaphore_mem>>)
    } else {
    }
    %c16_i32 = arith.constant 16 : i32
    %c0_i32_36 = arith.constant 0 : i32
    %61 = arith.cmpi eq, %c16_i32, %c0_i32_36 : i32
    %c1_i32_37 = arith.constant 1 : i32
    %62 = arith.select %61, %c1_i32_37, %c16_i32 : i32
    %63 = arith.remsi %c0_i32_32, %62 : i32
    %c0_i32_38 = arith.constant 0 : i32
    %64 = arith.cmpi ne, %63, %c0_i32_38 : i32
    %c0_i32_39 = arith.constant 0 : i32
    %65 = arith.cmpi slt, %63, %c0_i32_39 : i32
    %c0_i32_40 = arith.constant 0 : i32
    %66 = arith.cmpi slt, %62, %c0_i32_40 : i32
    %67 = arith.xori %65, %66 : i1
    %68 = arith.andi %67, %64 : i1
    %69 = arith.addi %63, %62 : i32
    %70 = arith.select %68, %69, %63 : i32
    %c0_i32_41 = arith.constant 0 : i32
    %c0_i32_42 = arith.constant 0 : i32
    %71 = tpu.memref_slice %arg2[%c0_i32_41, %c0_i32_42] : memref<256x128xf32, #tpu.memory_space<any>> -> memref<1x128xf32, #tpu.memory_space<any>>
    %c0_i32_43 = arith.constant 0 : i32
    %72 = tpu.memref_slice %arg6[%c0_i32_32, %c0_i32_43] : memref<8x128xf32, #tpu.memory_space<vmem>> -> memref<1x128xf32, #tpu.memory_space<vmem>>
    %73 = tpu.memref_slice %arg7[%70] : memref<16x!tpu.dma_semaphore, #tpu.memory_space<semaphore_mem>> -> memref<1x!tpu.dma_semaphore, #tpu.memory_space<semaphore_mem>>
    %74 = tpu.memref_squeeze %73 : memref<1x!tpu.dma_semaphore, #tpu.memory_space<semaphore_mem>> -> memref<!tpu.dma_semaphore, #tpu.memory_space<semaphore_mem>>
    tpu.wait_dma2 semaphore(%74 : memref<!tpu.dma_semaphore, #tpu.memory_space<semaphore_mem>>) src(%71 : memref<1x128xf32, #tpu.memory_space<any>>) dst(%72 : memref<1x128xf32, #tpu.memory_space<vmem>>)
    %c1_i32_44 = arith.constant 1 : i32
    %c8_i32_45 = arith.constant 8 : i32
    %75 = arith.addi %c1_i32_44, %c8_i32_45 : i32
    %c8_i32_46 = arith.constant 8 : i32
    %76 = arith.cmpi slt, %75, %c8_i32_46 : i32
    %77 = arith.extui %76 : i1 to i32
    %c0_i32_47 = arith.constant 0 : i32
    %78 = arith.cmpi ne, %77, %c0_i32_47 : i32
    scf.if %78 {
      %c8_i32_147 = arith.constant 8 : i32
      %227 = arith.addi %c1_i32_44, %c8_i32_147 : i32
      %228 = arith.addi %0, %227 : i32
      %229 = arith.index_cast %228 : i32 to index
      %230 = memref.load %arg1[%229] : memref<16xi32, #tpu.memory_space<smem>>
      %c16_i32_148 = arith.constant 16 : i32
      %c0_i32_149 = arith.constant 0 : i32
      %231 = arith.cmpi eq, %c16_i32_148, %c0_i32_149 : i32
      %c1_i32_150 = arith.constant 1 : i32
      %232 = arith.select %231, %c1_i32_150, %c16_i32_148 : i32
      %233 = arith.remsi %227, %232 : i32
      %c0_i32_151 = arith.constant 0 : i32
      %234 = arith.cmpi ne, %233, %c0_i32_151 : i32
      %c0_i32_152 = arith.constant 0 : i32
      %235 = arith.cmpi slt, %233, %c0_i32_152 : i32
      %c0_i32_153 = arith.constant 0 : i32
      %236 = arith.cmpi slt, %232, %c0_i32_153 : i32
      %237 = arith.xori %235, %236 : i1
      %238 = arith.andi %237, %234 : i1
      %239 = arith.addi %233, %232 : i32
      %240 = arith.select %238, %239, %233 : i32
      %c0_i32_154 = arith.constant 0 : i32
      %241 = tpu.memref_slice %arg2[%230, %c0_i32_154] : memref<256x128xf32, #tpu.memory_space<any>> -> memref<1x128xf32, #tpu.memory_space<any>>
      %c0_i32_155 = arith.constant 0 : i32
      %242 = tpu.memref_slice %arg6[%227, %c0_i32_155] : memref<8x128xf32, #tpu.memory_space<vmem>> -> memref<1x128xf32, #tpu.memory_space<vmem>>
      %243 = tpu.memref_slice %arg7[%240] : memref<16x!tpu.dma_semaphore, #tpu.memory_space<semaphore_mem>> -> memref<1x!tpu.dma_semaphore, #tpu.memory_space<semaphore_mem>>
      %244 = tpu.memref_squeeze %243 : memref<1x!tpu.dma_semaphore, #tpu.memory_space<semaphore_mem>> -> memref<!tpu.dma_semaphore, #tpu.memory_space<semaphore_mem>>
      tpu.enqueue_dma source(%241 : memref<1x128xf32, #tpu.memory_space<any>>) target(%242 : memref<1x128xf32, #tpu.memory_space<vmem>>) target_semaphore(%244 : memref<!tpu.dma_semaphore, #tpu.memory_space<semaphore_mem>>)
    } else {
    }
    %c16_i32_48 = arith.constant 16 : i32
    %c0_i32_49 = arith.constant 0 : i32
    %79 = arith.cmpi eq, %c16_i32_48, %c0_i32_49 : i32
    %c1_i32_50 = arith.constant 1 : i32
    %80 = arith.select %79, %c1_i32_50, %c16_i32_48 : i32
    %81 = arith.remsi %c1_i32_44, %80 : i32
    %c0_i32_51 = arith.constant 0 : i32
    %82 = arith.cmpi ne, %81, %c0_i32_51 : i32
    %c0_i32_52 = arith.constant 0 : i32
    %83 = arith.cmpi slt, %81, %c0_i32_52 : i32
    %c0_i32_53 = arith.constant 0 : i32
    %84 = arith.cmpi slt, %80, %c0_i32_53 : i32
    %85 = arith.xori %83, %84 : i1
    %86 = arith.andi %85, %82 : i1
    %87 = arith.addi %81, %80 : i32
    %88 = arith.select %86, %87, %81 : i32
    %c0_i32_54 = arith.constant 0 : i32
    %c0_i32_55 = arith.constant 0 : i32
    %89 = tpu.memref_slice %arg2[%c0_i32_54, %c0_i32_55] : memref<256x128xf32, #tpu.memory_space<any>> -> memref<1x128xf32, #tpu.memory_space<any>>
    %c0_i32_56 = arith.constant 0 : i32
    %90 = tpu.memref_slice %arg6[%c1_i32_44, %c0_i32_56] : memref<8x128xf32, #tpu.memory_space<vmem>> -> memref<1x128xf32, #tpu.memory_space<vmem>>
    %91 = tpu.memref_slice %arg7[%88] : memref<16x!tpu.dma_semaphore, #tpu.memory_space<semaphore_mem>> -> memref<1x!tpu.dma_semaphore, #tpu.memory_space<semaphore_mem>>
    %92 = tpu.memref_squeeze %91 : memref<1x!tpu.dma_semaphore, #tpu.memory_space<semaphore_mem>> -> memref<!tpu.dma_semaphore, #tpu.memory_space<semaphore_mem>>
    tpu.wait_dma2 semaphore(%92 : memref<!tpu.dma_semaphore, #tpu.memory_space<semaphore_mem>>) src(%89 : memref<1x128xf32, #tpu.memory_space<any>>) dst(%90 : memref<1x128xf32, #tpu.memory_space<vmem>>)
    %c2_i32_57 = arith.constant 2 : i32
    %c8_i32_58 = arith.constant 8 : i32
    %93 = arith.addi %c2_i32_57, %c8_i32_58 : i32
    %c8_i32_59 = arith.constant 8 : i32
    %94 = arith.cmpi slt, %93, %c8_i32_59 : i32
    %95 = arith.extui %94 : i1 to i32
    %c0_i32_60 = arith.constant 0 : i32
    %96 = arith.cmpi ne, %95, %c0_i32_60 : i32
    scf.if %96 {
      %c8_i32_147 = arith.constant 8 : i32
      %227 = arith.addi %c2_i32_57, %c8_i32_147 : i32
      %228 = arith.addi %0, %227 : i32
      %229 = arith.index_cast %228 : i32 to index
      %230 = memref.load %arg1[%229] : memref<16xi32, #tpu.memory_space<smem>>
      %c16_i32_148 = arith.constant 16 : i32
      %c0_i32_149 = arith.constant 0 : i32
      %231 = arith.cmpi eq, %c16_i32_148, %c0_i32_149 : i32
      %c1_i32_150 = arith.constant 1 : i32
      %232 = arith.select %231, %c1_i32_150, %c16_i32_148 : i32
      %233 = arith.remsi %227, %232 : i32
      %c0_i32_151 = arith.constant 0 : i32
      %234 = arith.cmpi ne, %233, %c0_i32_151 : i32
      %c0_i32_152 = arith.constant 0 : i32
      %235 = arith.cmpi slt, %233, %c0_i32_152 : i32
      %c0_i32_153 = arith.constant 0 : i32
      %236 = arith.cmpi slt, %232, %c0_i32_153 : i32
      %237 = arith.xori %235, %236 : i1
      %238 = arith.andi %237, %234 : i1
      %239 = arith.addi %233, %232 : i32
      %240 = arith.select %238, %239, %233 : i32
      %c0_i32_154 = arith.constant 0 : i32
      %241 = tpu.memref_slice %arg2[%230, %c0_i32_154] : memref<256x128xf32, #tpu.memory_space<any>> -> memref<1x128xf32, #tpu.memory_space<any>>
      %c0_i32_155 = arith.constant 0 : i32
      %242 = tpu.memref_slice %arg6[%227, %c0_i32_155] : memref<8x128xf32, #tpu.memory_space<vmem>> -> memref<1x128xf32, #tpu.memory_space<vmem>>
      %243 = tpu.memref_slice %arg7[%240] : memref<16x!tpu.dma_semaphore, #tpu.memory_space<semaphore_mem>> -> memref<1x!tpu.dma_semaphore, #tpu.memory_space<semaphore_mem>>
      %244 = tpu.memref_squeeze %243 : memref<1x!tpu.dma_semaphore, #tpu.memory_space<semaphore_mem>> -> memref<!tpu.dma_semaphore, #tpu.memory_space<semaphore_mem>>
      tpu.enqueue_dma source(%241 : memref<1x128xf32, #tpu.memory_space<any>>) target(%242 : memref<1x128xf32, #tpu.memory_space<vmem>>) target_semaphore(%244 : memref<!tpu.dma_semaphore, #tpu.memory_space<semaphore_mem>>)
    } else {
    }
    %c16_i32_61 = arith.constant 16 : i32
    %c0_i32_62 = arith.constant 0 : i32
    %97 = arith.cmpi eq, %c16_i32_61, %c0_i32_62 : i32
    %c1_i32_63 = arith.constant 1 : i32
    %98 = arith.select %97, %c1_i32_63, %c16_i32_61 : i32
    %99 = arith.remsi %c2_i32_57, %98 : i32
    %c0_i32_64 = arith.constant 0 : i32
    %100 = arith.cmpi ne, %99, %c0_i32_64 : i32
    %c0_i32_65 = arith.constant 0 : i32
    %101 = arith.cmpi slt, %99, %c0_i32_65 : i32
    %c0_i32_66 = arith.constant 0 : i32
    %102 = arith.cmpi slt, %98, %c0_i32_66 : i32
    %103 = arith.xori %101, %102 : i1
    %104 = arith.andi %103, %100 : i1
    %105 = arith.addi %99, %98 : i32
    %106 = arith.select %104, %105, %99 : i32
    %c0_i32_67 = arith.constant 0 : i32
    %c0_i32_68 = arith.constant 0 : i32
    %107 = tpu.memref_slice %arg2[%c0_i32_67, %c0_i32_68] : memref<256x128xf32, #tpu.memory_space<any>> -> memref<1x128xf32, #tpu.memory_space<any>>
    %c0_i32_69 = arith.constant 0 : i32
    %108 = tpu.memref_slice %arg6[%c2_i32_57, %c0_i32_69] : memref<8x128xf32, #tpu.memory_space<vmem>> -> memref<1x128xf32, #tpu.memory_space<vmem>>
    %109 = tpu.memref_slice %arg7[%106] : memref<16x!tpu.dma_semaphore, #tpu.memory_space<semaphore_mem>> -> memref<1x!tpu.dma_semaphore, #tpu.memory_space<semaphore_mem>>
    %110 = tpu.memref_squeeze %109 : memref<1x!tpu.dma_semaphore, #tpu.memory_space<semaphore_mem>> -> memref<!tpu.dma_semaphore, #tpu.memory_space<semaphore_mem>>
    tpu.wait_dma2 semaphore(%110 : memref<!tpu.dma_semaphore, #tpu.memory_space<semaphore_mem>>) src(%107 : memref<1x128xf32, #tpu.memory_space<any>>) dst(%108 : memref<1x128xf32, #tpu.memory_space<vmem>>)
    %c3_i32_70 = arith.constant 3 : i32
    %c8_i32_71 = arith.constant 8 : i32
    %111 = arith.addi %c3_i32_70, %c8_i32_71 : i32
    %c8_i32_72 = arith.constant 8 : i32
    %112 = arith.cmpi slt, %111, %c8_i32_72 : i32
    %113 = arith.extui %112 : i1 to i32
    %c0_i32_73 = arith.constant 0 : i32
    %114 = arith.cmpi ne, %113, %c0_i32_73 : i32
    scf.if %114 {
      %c8_i32_147 = arith.constant 8 : i32
      %227 = arith.addi %c3_i32_70, %c8_i32_147 : i32
      %228 = arith.addi %0, %227 : i32
      %229 = arith.index_cast %228 : i32 to index
      %230 = memref.load %arg1[%229] : memref<16xi32, #tpu.memory_space<smem>>
      %c16_i32_148 = arith.constant 16 : i32
      %c0_i32_149 = arith.constant 0 : i32
      %231 = arith.cmpi eq, %c16_i32_148, %c0_i32_149 : i32
      %c1_i32_150 = arith.constant 1 : i32
      %232 = arith.select %231, %c1_i32_150, %c16_i32_148 : i32
      %233 = arith.remsi %227, %232 : i32
      %c0_i32_151 = arith.constant 0 : i32
      %234 = arith.cmpi ne, %233, %c0_i32_151 : i32
      %c0_i32_152 = arith.constant 0 : i32
      %235 = arith.cmpi slt, %233, %c0_i32_152 : i32
      %c0_i32_153 = arith.constant 0 : i32
      %236 = arith.cmpi slt, %232, %c0_i32_153 : i32
      %237 = arith.xori %235, %236 : i1
      %238 = arith.andi %237, %234 : i1
      %239 = arith.addi %233, %232 : i32
      %240 = arith.select %238, %239, %233 : i32
      %c0_i32_154 = arith.constant 0 : i32
      %241 = tpu.memref_slice %arg2[%230, %c0_i32_154] : memref<256x128xf32, #tpu.memory_space<any>> -> memref<1x128xf32, #tpu.memory_space<any>>
      %c0_i32_155 = arith.constant 0 : i32
      %242 = tpu.memref_slice %arg6[%227, %c0_i32_155] : memref<8x128xf32, #tpu.memory_space<vmem>> -> memref<1x128xf32, #tpu.memory_space<vmem>>
      %243 = tpu.memref_slice %arg7[%240] : memref<16x!tpu.dma_semaphore, #tpu.memory_space<semaphore_mem>> -> memref<1x!tpu.dma_semaphore, #tpu.memory_space<semaphore_mem>>
      %244 = tpu.memref_squeeze %243 : memref<1x!tpu.dma_semaphore, #tpu.memory_space<semaphore_mem>> -> memref<!tpu.dma_semaphore, #tpu.memory_space<semaphore_mem>>
      tpu.enqueue_dma source(%241 : memref<1x128xf32, #tpu.memory_space<any>>) target(%242 : memref<1x128xf32, #tpu.memory_space<vmem>>) target_semaphore(%244 : memref<!tpu.dma_semaphore, #tpu.memory_space<semaphore_mem>>)
    } else {
    }
    %c16_i32_74 = arith.constant 16 : i32
    %c0_i32_75 = arith.constant 0 : i32
    %115 = arith.cmpi eq, %c16_i32_74, %c0_i32_75 : i32
    %c1_i32_76 = arith.constant 1 : i32
    %116 = arith.select %115, %c1_i32_76, %c16_i32_74 : i32
    %117 = arith.remsi %c3_i32_70, %116 : i32
    %c0_i32_77 = arith.constant 0 : i32
    %118 = arith.cmpi ne, %117, %c0_i32_77 : i32
    %c0_i32_78 = arith.constant 0 : i32
    %119 = arith.cmpi slt, %117, %c0_i32_78 : i32
    %c0_i32_79 = arith.constant 0 : i32
    %120 = arith.cmpi slt, %116, %c0_i32_79 : i32
    %121 = arith.xori %119, %120 : i1
    %122 = arith.andi %121, %118 : i1
    %123 = arith.addi %117, %116 : i32
    %124 = arith.select %122, %123, %117 : i32
    %c0_i32_80 = arith.constant 0 : i32
    %c0_i32_81 = arith.constant 0 : i32
    %125 = tpu.memref_slice %arg2[%c0_i32_80, %c0_i32_81] : memref<256x128xf32, #tpu.memory_space<any>> -> memref<1x128xf32, #tpu.memory_space<any>>
    %c0_i32_82 = arith.constant 0 : i32
    %126 = tpu.memref_slice %arg6[%c3_i32_70, %c0_i32_82] : memref<8x128xf32, #tpu.memory_space<vmem>> -> memref<1x128xf32, #tpu.memory_space<vmem>>
    %127 = tpu.memref_slice %arg7[%124] : memref<16x!tpu.dma_semaphore, #tpu.memory_space<semaphore_mem>> -> memref<1x!tpu.dma_semaphore, #tpu.memory_space<semaphore_mem>>
    %128 = tpu.memref_squeeze %127 : memref<1x!tpu.dma_semaphore, #tpu.memory_space<semaphore_mem>> -> memref<!tpu.dma_semaphore, #tpu.memory_space<semaphore_mem>>
    tpu.wait_dma2 semaphore(%128 : memref<!tpu.dma_semaphore, #tpu.memory_space<semaphore_mem>>) src(%125 : memref<1x128xf32, #tpu.memory_space<any>>) dst(%126 : memref<1x128xf32, #tpu.memory_space<vmem>>)
    %c4_i32_83 = arith.constant 4 : i32
    %c8_i32_84 = arith.constant 8 : i32
    %129 = arith.addi %c4_i32_83, %c8_i32_84 : i32
    %c8_i32_85 = arith.constant 8 : i32
    %130 = arith.cmpi slt, %129, %c8_i32_85 : i32
    %131 = arith.extui %130 : i1 to i32
    %c0_i32_86 = arith.constant 0 : i32
    %132 = arith.cmpi ne, %131, %c0_i32_86 : i32
    scf.if %132 {
      %c8_i32_147 = arith.constant 8 : i32
      %227 = arith.addi %c4_i32_83, %c8_i32_147 : i32
      %228 = arith.addi %0, %227 : i32
      %229 = arith.index_cast %228 : i32 to index
      %230 = memref.load %arg1[%229] : memref<16xi32, #tpu.memory_space<smem>>
      %c16_i32_148 = arith.constant 16 : i32
      %c0_i32_149 = arith.constant 0 : i32
      %231 = arith.cmpi eq, %c16_i32_148, %c0_i32_149 : i32
      %c1_i32_150 = arith.constant 1 : i32
      %232 = arith.select %231, %c1_i32_150, %c16_i32_148 : i32
      %233 = arith.remsi %227, %232 : i32
      %c0_i32_151 = arith.constant 0 : i32
      %234 = arith.cmpi ne, %233, %c0_i32_151 : i32
      %c0_i32_152 = arith.constant 0 : i32
      %235 = arith.cmpi slt, %233, %c0_i32_152 : i32
      %c0_i32_153 = arith.constant 0 : i32
      %236 = arith.cmpi slt, %232, %c0_i32_153 : i32
      %237 = arith.xori %235, %236 : i1
      %238 = arith.andi %237, %234 : i1
      %239 = arith.addi %233, %232 : i32
      %240 = arith.select %238, %239, %233 : i32
      %c0_i32_154 = arith.constant 0 : i32
      %241 = tpu.memref_slice %arg2[%230, %c0_i32_154] : memref<256x128xf32, #tpu.memory_space<any>> -> memref<1x128xf32, #tpu.memory_space<any>>
      %c0_i32_155 = arith.constant 0 : i32
      %242 = tpu.memref_slice %arg6[%227, %c0_i32_155] : memref<8x128xf32, #tpu.memory_space<vmem>> -> memref<1x128xf32, #tpu.memory_space<vmem>>
      %243 = tpu.memref_slice %arg7[%240] : memref<16x!tpu.dma_semaphore, #tpu.memory_space<semaphore_mem>> -> memref<1x!tpu.dma_semaphore, #tpu.memory_space<semaphore_mem>>
      %244 = tpu.memref_squeeze %243 : memref<1x!tpu.dma_semaphore, #tpu.memory_space<semaphore_mem>> -> memref<!tpu.dma_semaphore, #tpu.memory_space<semaphore_mem>>
      tpu.enqueue_dma source(%241 : memref<1x128xf32, #tpu.memory_space<any>>) target(%242 : memref<1x128xf32, #tpu.memory_space<vmem>>) target_semaphore(%244 : memref<!tpu.dma_semaphore, #tpu.memory_space<semaphore_mem>>)
    } else {
    }
    %c16_i32_87 = arith.constant 16 : i32
    %c0_i32_88 = arith.constant 0 : i32
    %133 = arith.cmpi eq, %c16_i32_87, %c0_i32_88 : i32
    %c1_i32_89 = arith.constant 1 : i32
    %134 = arith.select %133, %c1_i32_89, %c16_i32_87 : i32
    %135 = arith.remsi %c4_i32_83, %134 : i32
    %c0_i32_90 = arith.constant 0 : i32
    %136 = arith.cmpi ne, %135, %c0_i32_90 : i32
    %c0_i32_91 = arith.constant 0 : i32
    %137 = arith.cmpi slt, %135, %c0_i32_91 : i32
    %c0_i32_92 = arith.constant 0 : i32
    %138 = arith.cmpi slt, %134, %c0_i32_92 : i32
    %139 = arith.xori %137, %138 : i1
    %140 = arith.andi %139, %136 : i1
    %141 = arith.addi %135, %134 : i32
    %142 = arith.select %140, %141, %135 : i32
    %c0_i32_93 = arith.constant 0 : i32
    %c0_i32_94 = arith.constant 0 : i32
    %143 = tpu.memref_slice %arg2[%c0_i32_93, %c0_i32_94] : memref<256x128xf32, #tpu.memory_space<any>> -> memref<1x128xf32, #tpu.memory_space<any>>
    %c0_i32_95 = arith.constant 0 : i32
    %144 = tpu.memref_slice %arg6[%c4_i32_83, %c0_i32_95] : memref<8x128xf32, #tpu.memory_space<vmem>> -> memref<1x128xf32, #tpu.memory_space<vmem>>
    %145 = tpu.memref_slice %arg7[%142] : memref<16x!tpu.dma_semaphore, #tpu.memory_space<semaphore_mem>> -> memref<1x!tpu.dma_semaphore, #tpu.memory_space<semaphore_mem>>
    %146 = tpu.memref_squeeze %145 : memref<1x!tpu.dma_semaphore, #tpu.memory_space<semaphore_mem>> -> memref<!tpu.dma_semaphore, #tpu.memory_space<semaphore_mem>>
    tpu.wait_dma2 semaphore(%146 : memref<!tpu.dma_semaphore, #tpu.memory_space<semaphore_mem>>) src(%143 : memref<1x128xf32, #tpu.memory_space<any>>) dst(%144 : memref<1x128xf32, #tpu.memory_space<vmem>>)
    %c5_i32_96 = arith.constant 5 : i32
    %c8_i32_97 = arith.constant 8 : i32
    %147 = arith.addi %c5_i32_96, %c8_i32_97 : i32
    %c8_i32_98 = arith.constant 8 : i32
    %148 = arith.cmpi slt, %147, %c8_i32_98 : i32
    %149 = arith.extui %148 : i1 to i32
    %c0_i32_99 = arith.constant 0 : i32
    %150 = arith.cmpi ne, %149, %c0_i32_99 : i32
    scf.if %150 {
      %c8_i32_147 = arith.constant 8 : i32
      %227 = arith.addi %c5_i32_96, %c8_i32_147 : i32
      %228 = arith.addi %0, %227 : i32
      %229 = arith.index_cast %228 : i32 to index
      %230 = memref.load %arg1[%229] : memref<16xi32, #tpu.memory_space<smem>>
      %c16_i32_148 = arith.constant 16 : i32
      %c0_i32_149 = arith.constant 0 : i32
      %231 = arith.cmpi eq, %c16_i32_148, %c0_i32_149 : i32
      %c1_i32_150 = arith.constant 1 : i32
      %232 = arith.select %231, %c1_i32_150, %c16_i32_148 : i32
      %233 = arith.remsi %227, %232 : i32
      %c0_i32_151 = arith.constant 0 : i32
      %234 = arith.cmpi ne, %233, %c0_i32_151 : i32
      %c0_i32_152 = arith.constant 0 : i32
      %235 = arith.cmpi slt, %233, %c0_i32_152 : i32
      %c0_i32_153 = arith.constant 0 : i32
      %236 = arith.cmpi slt, %232, %c0_i32_153 : i32
      %237 = arith.xori %235, %236 : i1
      %238 = arith.andi %237, %234 : i1
      %239 = arith.addi %233, %232 : i32
      %240 = arith.select %238, %239, %233 : i32
      %c0_i32_154 = arith.constant 0 : i32
      %241 = tpu.memref_slice %arg2[%230, %c0_i32_154] : memref<256x128xf32, #tpu.memory_space<any>> -> memref<1x128xf32, #tpu.memory_space<any>>
      %c0_i32_155 = arith.constant 0 : i32
      %242 = tpu.memref_slice %arg6[%227, %c0_i32_155] : memref<8x128xf32, #tpu.memory_space<vmem>> -> memref<1x128xf32, #tpu.memory_space<vmem>>
      %243 = tpu.memref_slice %arg7[%240] : memref<16x!tpu.dma_semaphore, #tpu.memory_space<semaphore_mem>> -> memref<1x!tpu.dma_semaphore, #tpu.memory_space<semaphore_mem>>
      %244 = tpu.memref_squeeze %243 : memref<1x!tpu.dma_semaphore, #tpu.memory_space<semaphore_mem>> -> memref<!tpu.dma_semaphore, #tpu.memory_space<semaphore_mem>>
      tpu.enqueue_dma source(%241 : memref<1x128xf32, #tpu.memory_space<any>>) target(%242 : memref<1x128xf32, #tpu.memory_space<vmem>>) target_semaphore(%244 : memref<!tpu.dma_semaphore, #tpu.memory_space<semaphore_mem>>)
    } else {
    }
    %c16_i32_100 = arith.constant 16 : i32
    %c0_i32_101 = arith.constant 0 : i32
    %151 = arith.cmpi eq, %c16_i32_100, %c0_i32_101 : i32
    %c1_i32_102 = arith.constant 1 : i32
    %152 = arith.select %151, %c1_i32_102, %c16_i32_100 : i32
    %153 = arith.remsi %c5_i32_96, %152 : i32
    %c0_i32_103 = arith.constant 0 : i32
    %154 = arith.cmpi ne, %153, %c0_i32_103 : i32
    %c0_i32_104 = arith.constant 0 : i32
    %155 = arith.cmpi slt, %153, %c0_i32_104 : i32
    %c0_i32_105 = arith.constant 0 : i32
    %156 = arith.cmpi slt, %152, %c0_i32_105 : i32
    %157 = arith.xori %155, %156 : i1
    %158 = arith.andi %157, %154 : i1
    %159 = arith.addi %153, %152 : i32
    %160 = arith.select %158, %159, %153 : i32
    %c0_i32_106 = arith.constant 0 : i32
    %c0_i32_107 = arith.constant 0 : i32
    %161 = tpu.memref_slice %arg2[%c0_i32_106, %c0_i32_107] : memref<256x128xf32, #tpu.memory_space<any>> -> memref<1x128xf32, #tpu.memory_space<any>>
    %c0_i32_108 = arith.constant 0 : i32
    %162 = tpu.memref_slice %arg6[%c5_i32_96, %c0_i32_108] : memref<8x128xf32, #tpu.memory_space<vmem>> -> memref<1x128xf32, #tpu.memory_space<vmem>>
    %163 = tpu.memref_slice %arg7[%160] : memref<16x!tpu.dma_semaphore, #tpu.memory_space<semaphore_mem>> -> memref<1x!tpu.dma_semaphore, #tpu.memory_space<semaphore_mem>>
    %164 = tpu.memref_squeeze %163 : memref<1x!tpu.dma_semaphore, #tpu.memory_space<semaphore_mem>> -> memref<!tpu.dma_semaphore, #tpu.memory_space<semaphore_mem>>
    tpu.wait_dma2 semaphore(%164 : memref<!tpu.dma_semaphore, #tpu.memory_space<semaphore_mem>>) src(%161 : memref<1x128xf32, #tpu.memory_space<any>>) dst(%162 : memref<1x128xf32, #tpu.memory_space<vmem>>)
    %c6_i32_109 = arith.constant 6 : i32
    %c8_i32_110 = arith.constant 8 : i32
    %165 = arith.addi %c6_i32_109, %c8_i32_110 : i32
    %c8_i32_111 = arith.constant 8 : i32
    %166 = arith.cmpi slt, %165, %c8_i32_111 : i32
    %167 = arith.extui %166 : i1 to i32
    %c0_i32_112 = arith.constant 0 : i32
    %168 = arith.cmpi ne, %167, %c0_i32_112 : i32
    scf.if %168 {
      %c8_i32_147 = arith.constant 8 : i32
      %227 = arith.addi %c6_i32_109, %c8_i32_147 : i32
      %228 = arith.addi %0, %227 : i32
      %229 = arith.index_cast %228 : i32 to index
      %230 = memref.load %arg1[%229] : memref<16xi32, #tpu.memory_space<smem>>
      %c16_i32_148 = arith.constant 16 : i32
      %c0_i32_149 = arith.constant 0 : i32
      %231 = arith.cmpi eq, %c16_i32_148, %c0_i32_149 : i32
      %c1_i32_150 = arith.constant 1 : i32
      %232 = arith.select %231, %c1_i32_150, %c16_i32_148 : i32
      %233 = arith.remsi %227, %232 : i32
      %c0_i32_151 = arith.constant 0 : i32
      %234 = arith.cmpi ne, %233, %c0_i32_151 : i32
      %c0_i32_152 = arith.constant 0 : i32
      %235 = arith.cmpi slt, %233, %c0_i32_152 : i32
      %c0_i32_153 = arith.constant 0 : i32
      %236 = arith.cmpi slt, %232, %c0_i32_153 : i32
      %237 = arith.xori %235, %236 : i1
      %238 = arith.andi %237, %234 : i1
      %239 = arith.addi %233, %232 : i32
      %240 = arith.select %238, %239, %233 : i32
      %c0_i32_154 = arith.constant 0 : i32
      %241 = tpu.memref_slice %arg2[%230, %c0_i32_154] : memref<256x128xf32, #tpu.memory_space<any>> -> memref<1x128xf32, #tpu.memory_space<any>>
      %c0_i32_155 = arith.constant 0 : i32
      %242 = tpu.memref_slice %arg6[%227, %c0_i32_155] : memref<8x128xf32, #tpu.memory_space<vmem>> -> memref<1x128xf32, #tpu.memory_space<vmem>>
      %243 = tpu.memref_slice %arg7[%240] : memref<16x!tpu.dma_semaphore, #tpu.memory_space<semaphore_mem>> -> memref<1x!tpu.dma_semaphore, #tpu.memory_space<semaphore_mem>>
      %244 = tpu.memref_squeeze %243 : memref<1x!tpu.dma_semaphore, #tpu.memory_space<semaphore_mem>> -> memref<!tpu.dma_semaphore, #tpu.memory_space<semaphore_mem>>
      tpu.enqueue_dma source(%241 : memref<1x128xf32, #tpu.memory_space<any>>) target(%242 : memref<1x128xf32, #tpu.memory_space<vmem>>) target_semaphore(%244 : memref<!tpu.dma_semaphore, #tpu.memory_space<semaphore_mem>>)
    } else {
    }
    %c16_i32_113 = arith.constant 16 : i32
    %c0_i32_114 = arith.constant 0 : i32
    %169 = arith.cmpi eq, %c16_i32_113, %c0_i32_114 : i32
    %c1_i32_115 = arith.constant 1 : i32
    %170 = arith.select %169, %c1_i32_115, %c16_i32_113 : i32
    %171 = arith.remsi %c6_i32_109, %170 : i32
    %c0_i32_116 = arith.constant 0 : i32
    %172 = arith.cmpi ne, %171, %c0_i32_116 : i32
    %c0_i32_117 = arith.constant 0 : i32
    %173 = arith.cmpi slt, %171, %c0_i32_117 : i32
    %c0_i32_118 = arith.constant 0 : i32
    %174 = arith.cmpi slt, %170, %c0_i32_118 : i32
    %175 = arith.xori %173, %174 : i1
    %176 = arith.andi %175, %172 : i1
    %177 = arith.addi %171, %170 : i32
    %178 = arith.select %176, %177, %171 : i32
    %c0_i32_119 = arith.constant 0 : i32
    %c0_i32_120 = arith.constant 0 : i32
    %179 = tpu.memref_slice %arg2[%c0_i32_119, %c0_i32_120] : memref<256x128xf32, #tpu.memory_space<any>> -> memref<1x128xf32, #tpu.memory_space<any>>
    %c0_i32_121 = arith.constant 0 : i32
    %180 = tpu.memref_slice %arg6[%c6_i32_109, %c0_i32_121] : memref<8x128xf32, #tpu.memory_space<vmem>> -> memref<1x128xf32, #tpu.memory_space<vmem>>
    %181 = tpu.memref_slice %arg7[%178] : memref<16x!tpu.dma_semaphore, #tpu.memory_space<semaphore_mem>> -> memref<1x!tpu.dma_semaphore, #tpu.memory_space<semaphore_mem>>
    %182 = tpu.memref_squeeze %181 : memref<1x!tpu.dma_semaphore, #tpu.memory_space<semaphore_mem>> -> memref<!tpu.dma_semaphore, #tpu.memory_space<semaphore_mem>>
    tpu.wait_dma2 semaphore(%182 : memref<!tpu.dma_semaphore, #tpu.memory_space<semaphore_mem>>) src(%179 : memref<1x128xf32, #tpu.memory_space<any>>) dst(%180 : memref<1x128xf32, #tpu.memory_space<vmem>>)
    %c7_i32_122 = arith.constant 7 : i32
    %c8_i32_123 = arith.constant 8 : i32
    %183 = arith.addi %c7_i32_122, %c8_i32_123 : i32
    %c8_i32_124 = arith.constant 8 : i32
    %184 = arith.cmpi slt, %183, %c8_i32_124 : i32
    %185 = arith.extui %184 : i1 to i32
    %c0_i32_125 = arith.constant 0 : i32
    %186 = arith.cmpi ne, %185, %c0_i32_125 : i32
    scf.if %186 {
      %c8_i32_147 = arith.constant 8 : i32
      %227 = arith.addi %c7_i32_122, %c8_i32_147 : i32
      %228 = arith.addi %0, %227 : i32
      %229 = arith.index_cast %228 : i32 to index
      %230 = memref.load %arg1[%229] : memref<16xi32, #tpu.memory_space<smem>>
      %c16_i32_148 = arith.constant 16 : i32
      %c0_i32_149 = arith.constant 0 : i32
      %231 = arith.cmpi eq, %c16_i32_148, %c0_i32_149 : i32
      %c1_i32_150 = arith.constant 1 : i32
      %232 = arith.select %231, %c1_i32_150, %c16_i32_148 : i32
      %233 = arith.remsi %227, %232 : i32
      %c0_i32_151 = arith.constant 0 : i32
      %234 = arith.cmpi ne, %233, %c0_i32_151 : i32
      %c0_i32_152 = arith.constant 0 : i32
      %235 = arith.cmpi slt, %233, %c0_i32_152 : i32
      %c0_i32_153 = arith.constant 0 : i32
      %236 = arith.cmpi slt, %232, %c0_i32_153 : i32
      %237 = arith.xori %235, %236 : i1
      %238 = arith.andi %237, %234 : i1
      %239 = arith.addi %233, %232 : i32
      %240 = arith.select %238, %239, %233 : i32
      %c0_i32_154 = arith.constant 0 : i32
      %241 = tpu.memref_slice %arg2[%230, %c0_i32_154] : memref<256x128xf32, #tpu.memory_space<any>> -> memref<1x128xf32, #tpu.memory_space<any>>
      %c0_i32_155 = arith.constant 0 : i32
      %242 = tpu.memref_slice %arg6[%227, %c0_i32_155] : memref<8x128xf32, #tpu.memory_space<vmem>> -> memref<1x128xf32, #tpu.memory_space<vmem>>
      %243 = tpu.memref_slice %arg7[%240] : memref<16x!tpu.dma_semaphore, #tpu.memory_space<semaphore_mem>> -> memref<1x!tpu.dma_semaphore, #tpu.memory_space<semaphore_mem>>
      %244 = tpu.memref_squeeze %243 : memref<1x!tpu.dma_semaphore, #tpu.memory_space<semaphore_mem>> -> memref<!tpu.dma_semaphore, #tpu.memory_space<semaphore_mem>>
      tpu.enqueue_dma source(%241 : memref<1x128xf32, #tpu.memory_space<any>>) target(%242 : memref<1x128xf32, #tpu.memory_space<vmem>>) target_semaphore(%244 : memref<!tpu.dma_semaphore, #tpu.memory_space<semaphore_mem>>)
    } else {
    }
    %c16_i32_126 = arith.constant 16 : i32
    %c0_i32_127 = arith.constant 0 : i32
    %187 = arith.cmpi eq, %c16_i32_126, %c0_i32_127 : i32
    %c1_i32_128 = arith.constant 1 : i32
    %188 = arith.select %187, %c1_i32_128, %c16_i32_126 : i32
    %189 = arith.remsi %c7_i32_122, %188 : i32
    %c0_i32_129 = arith.constant 0 : i32
    %190 = arith.cmpi ne, %189, %c0_i32_129 : i32
    %c0_i32_130 = arith.constant 0 : i32
    %191 = arith.cmpi slt, %189, %c0_i32_130 : i32
    %c0_i32_131 = arith.constant 0 : i32
    %192 = arith.cmpi slt, %188, %c0_i32_131 : i32
    %193 = arith.xori %191, %192 : i1
    %194 = arith.andi %193, %190 : i1
    %195 = arith.addi %189, %188 : i32
    %196 = arith.select %194, %195, %189 : i32
    %c0_i32_132 = arith.constant 0 : i32
    %c0_i32_133 = arith.constant 0 : i32
    %197 = tpu.memref_slice %arg2[%c0_i32_132, %c0_i32_133] : memref<256x128xf32, #tpu.memory_space<any>> -> memref<1x128xf32, #tpu.memory_space<any>>
    %c0_i32_134 = arith.constant 0 : i32
    %198 = tpu.memref_slice %arg6[%c7_i32_122, %c0_i32_134] : memref<8x128xf32, #tpu.memory_space<vmem>> -> memref<1x128xf32, #tpu.memory_space<vmem>>
    %199 = tpu.memref_slice %arg7[%196] : memref<16x!tpu.dma_semaphore, #tpu.memory_space<semaphore_mem>> -> memref<1x!tpu.dma_semaphore, #tpu.memory_space<semaphore_mem>>
    %200 = tpu.memref_squeeze %199 : memref<1x!tpu.dma_semaphore, #tpu.memory_space<semaphore_mem>> -> memref<!tpu.dma_semaphore, #tpu.memory_space<semaphore_mem>>
    tpu.wait_dma2 semaphore(%200 : memref<!tpu.dma_semaphore, #tpu.memory_space<semaphore_mem>>) src(%197 : memref<1x128xf32, #tpu.memory_space<any>>) dst(%198 : memref<1x128xf32, #tpu.memory_space<vmem>>)
    %c8_i32_135 = arith.constant 8 : i32
    %c0 = arith.constant 0 : index
    %c0_136 = arith.constant 0 : index
    %201 = vector.load %arg6[%c0, %c0_136] : memref<8x128xf32, #tpu.memory_space<vmem>>, vector<8x128xf32>
    %cst = arith.constant dense<0.000000e+00> : vector<8xf32>
    %202 = vector.multi_reduction <add>, %201, %cst [1] : vector<8x128xf32> to vector<8xf32>
    %203 = vector.shape_cast %202 : vector<8xf32> to vector<8x1xf32>
    %204 = arith.mulf %201, %201 : vector<8x128xf32>
    %cst_137 = arith.constant dense<0.000000e+00> : vector<8xf32>
    %205 = vector.multi_reduction <add>, %204, %cst_137 [1] : vector<8x128xf32> to vector<8xf32>
    %206 = vector.shape_cast %205 : vector<8xf32> to vector<8x1xf32>
    %cst_138 = arith.constant 7.812500e-03 : f32
    %207 = vector.broadcast %cst_138 : f32 to vector<8x1xf32>
    %208 = arith.mulf %203, %207 : vector<8x1xf32>
    %cst_139 = arith.constant 7.812500e-03 : f32
    %209 = vector.broadcast %cst_139 : f32 to vector<8x1xf32>
    %210 = arith.mulf %206, %209 : vector<8x1xf32>
    %211 = arith.mulf %208, %208 : vector<8x1xf32>
    %212 = arith.subf %210, %211 : vector<8x1xf32>
    %cst_140 = arith.constant 9.99999974E-6 : f32
    %213 = vector.broadcast %cst_140 : f32 to vector<8x1xf32>
    %214 = arith.addf %212, %213 : vector<8x1xf32>
    %215 = math.rsqrt %214 : vector<8x1xf32>
    %216 = vector.broadcast %208 : vector<8x1xf32> to vector<8x128xf32>
    %217 = arith.subf %201, %216 : vector<8x128xf32>
    %218 = vector.broadcast %215 : vector<8x1xf32> to vector<8x128xf32>
    %219 = arith.mulf %217, %218 : vector<8x128xf32>
    %c0_141 = arith.constant 0 : index
    %c0_142 = arith.constant 0 : index
    %220 = vector.load %arg3[%c0_141, %c0_142] : memref<1x128xf32, #tpu.memory_space<vmem>>, vector<1x128xf32>
    %221 = vector.broadcast %220 : vector<1x128xf32> to vector<8x128xf32>
    %222 = arith.mulf %219, %221 : vector<8x128xf32>
    %c0_143 = arith.constant 0 : index
    %c0_144 = arith.constant 0 : index
    %223 = vector.load %arg4[%c0_143, %c0_144] : memref<1x128xf32, #tpu.memory_space<vmem>>, vector<1x128xf32>
    %224 = vector.broadcast %223 : vector<1x128xf32> to vector<8x128xf32>
    %225 = arith.addf %222, %224 : vector<8x128xf32>
    %c0_145 = arith.constant 0 : index
    %c0_146 = arith.constant 0 : index
    %226 = vector.load %arg5[%c0_145, %c0_146] : memref<8x128xf32, #tpu.memory_space<vmem>>, vector<8x128xf32>
    tpu.vector_store %arg5[%c0_145, %c0_146], %225 {strides = array<i32>} : memref<8x128xf32, #tpu.memory_space<vmem>>, vector<8x128xf32>,
    return
  }
  func.func @transform_1(%arg0: i32, %arg1: memref<16xi32, #tpu.memory_space<smem>>) -> (i32, i32) {
    %c0_i32 = arith.constant 0 : i32
    %c0_i32_0 = arith.constant 0 : i32
    %c0_i32_1 = arith.constant 0 : i32
    return %c0_i32, %c0_i32_0 : i32, i32
  }
  func.func @transform_2(%arg0: i32, %arg1: memref<16xi32, #tpu.memory_space<smem>>) -> (i32, i32) {
    %c0_i32 = arith.constant 0 : i32
    %c0_i32_0 = arith.constant 0 : i32
    %c0_i32_1 = arith.constant 0 : i32
    return %c0_i32, %c0_i32_0 : i32, i32
  }
  func.func @transform_3(%arg0: i32, %arg1: memref<16xi32, #tpu.memory_space<smem>>) -> (i32, i32) {
    %c0_i32 = arith.constant 0 : i32
    %c0_i32_0 = arith.constant 0 : i32
    return %arg0, %c0_i32 : i32, i32
  }
}

</mosaic_0001>

<bundles_post_ra>
// kernel: tpu_custom_call.1
= control target key start
LH: loop header
LB: loop body
LE: loop exit
PB: predicated region body
PF: predicated region fallthrough
CT: control target
= control target key end

     0   :  { %s870_s18 = smov [#allocation5]   ;;  %s1093_s0 = inlined_call_operand.hbm [shape: s32[16], index: 0, kind: input, shape index: {}]   ;;  %s1094_s1 = inlined_call_operand.hbm [shape: f32[256,128], index: 1, kind: input, shape index: {}]   ;;  %s1095_s2 = inlined_call_operand.vmem [shape: f32[1,128], index: 2, kind: input, shape index: {}]   ;;  %s1096_s3 = inlined_call_operand.vmem [shape: f32[1,128], index: 3, kind: input, shape index: {}]   ;;  %s1097_s4 = inlined_call_operand.hbm [shape: f32[16,128], index: 4, kind: output, shape index: {}]  }
   0x1   :  { %s10_s17 = sshll.u32 %s1093_s0, 4  ;;  %s11_s17 = int_to_ptr.hbm [resolvable:$true] %s10_s17 }
   0x2   :  { %13 = dma.hbm_to_smem %s11_s17, 16, %s870_s18, [#allocation4] }
   0x3   :  { %832 = dma.done.wait [#allocation4], 16 }
   0x4   :  { %833 = vsyncadd [#allocation4], 4294967280 }
   0x5   :  { %16 = sfence }
   0x6   :  { %17 = vsyncpa [#allocation7], 0 }
   0x7   :  { %19 = vsyncpa [#allocation7 + $0x1], 0  ;;  %s907_s19 = smov 0   ;;  %s909_s20 = smov 0  }
   0x8   :  { %s911_s21 = smov 0   ;;  %s913_s22 = smov 0  }
   0x9 LB: > { %s506_s0 = sadd.s32 4294967295, %s868_s22   ;;  %s507_s23 = sadd.s32 4294967294, %s868_s22   ;;  %s868_s22 = sphi %s913_s22, %s1111_s22   ;;  %s864_s21 = sphi %s911_s21, %s1110_s21   ;;  %s860_s20 = sphi %s909_s20, %s1109_s20   ;;  %s856_s19 = sphi %s907_s19, %s1108_s19  }
   0xa   : > { %s930_s24 = sadd.s32 1, %s868_s22   ;;  %s74_s25 = sadd.s32 1, %s864_s21 }
   0xb   : > { %s71_s26 = ssub.s32 %s868_s22, %s930_s24  ;;  %p84_p0 = scmp.ne.s32.totalorder %s864_s21, %s860_s20 }
   0xc   : > { %p72_p1 = scmp.eq.s32.totalorder %s71_s26, 0  ;;  %p85_p2 = scmp.eq.s32.totalorder %s506_s0, 1 }
   0xd   : > { %p90_p3 = scmp.ne.s32.totalorder %s860_s20, %s856_s19  ;;  %p91_p4 = scmp.eq.s32.totalorder %s507_s23, 1 }
   0xe   : > { %s940_s27 = scalar_select %p72_p1, %s864_s21, %s74_s25  }
   0xf   : > { %p942_p5 = por %p85_p2, %p84_p0  ;;  %p946_p6 = por %p91_p4, %p90_p3 }
  0x10   : > { %1100 = sst [smem:[#allocation36_spill]] %s940_s27  ;;  %p509_p7 = scmp.ge.s32.totalorder %s868_s22, 1 }
  0x11   : > { %p115_p8 = scmp.lt.s32.totalorder %s868_s22, 3 }
  0x13   : > { %p116_p9 = pnand %p509_p7, %p115_p8 }
  0x15   : > { %119 = sbr.rel (%p116_p9) target bundleno = 310 (0x136), region = 28 }
  0x1a   : > { %s1098_s30 = sand.u32 1, %s860_s20   ;;  %s953_s5 = sshll.u32 %s506_s0, 3 }
  0x1b   : > { %s957_s6 = sshll.u32 %s1098_s30, 3  ;;  %s133_s7 = sld [smem:[#allocation5 + %s953_s5]] }
  0x1c   : > { %s871_s8 = smov [#allocation2]   ;;  %s148_s10 = sadd.s32 1, %s953_s5 }
  0x1d   : > { %s144_s9 = sshll.u32 %s871_s8, 4  ;;  %s149_s11 = sld [smem:[#allocation5 + %s148_s10]]  ;;  %s145_s9 = int_to_ptr.vmem [resolvable:$true] %s144_s9 }
  0x1e   : > { %s166_s12 = sadd.s32 2, %s953_s5  ;;  %s872_s13 = smov [#allocation2 + $0x1]  }
  0x1f   : > { %s962_s14 = sshll.u32 %s872_s13, 4  ;;  %s167_s15 = sld [smem:[#allocation5 + %s166_s12]]  ;;  %s163_s14 = int_to_ptr.vmem [resolvable:$true] %s962_s14 }
  0x20   : > { %s873_s23 = smov [#allocation2 + $0x2]   ;;  %s973_s13 = scalar_lea.hbm %s1094_s1, 256 }
  0x21   : > { %s134_s18 = scalar_lea.hbm %s1094_s1, %s133_s7  ;;  %s968_s25 = sshll.u32 %s873_s23, 4  ;;  %s181_s25 = int_to_ptr.vmem [resolvable:$true] %s968_s25 }
  0x22   : > { %s142_s0 = sshll.u32 %s134_s18, 4  ;;  %s143_s0 = int_to_ptr.hbm [resolvable:$true] %s142_s0 }
  0x23   : > { %s596_s26 = sshra.s32 %s143_s0, 4  ;;  %s597_s26 = int_to_ptr.hbm [resolvable:$true] %s596_s26 }
  0x24   : > { %s598_s8 = scalar_lea.hbm %s597_s26, 1  ;;  %p601_p11 = scmp.lt.s32.totalorder %s597_s26, %s1094_s1 }
  0x25   : > { %p599_p10 = scmp.ne.s32.totalorder %s597_s26, %s598_s8  ;;  %p602_p12 = scmp.lt.s32.totalorder %s973_s13, %s598_s8 }
  0x27   : > { %p603_p13 = por %p602_p12, %p601_p11 }
  0x29   : > { %p604_p0 = pnand %p603_p13, %p599_p10 }
  0x2b   : > { %607 = shalt.err (!%p604_p0)  }
  0x2c   : > { %147 = dma.hbm_to_vmem [thread:$0]  %s143_s0, 16, %s145_s9, [#allocation3] }
  0x2d   : > { %s150_s17 = scalar_lea.hbm %s1094_s1, %s149_s11  ;;  %s168_s10 = scalar_lea.hbm %s1094_s1, %s167_s15 }
  0x2e   : > { %s160_s30 = sshll.u32 %s150_s17, 4  ;;  %s178_s27 = sshll.u32 %s168_s10, 4  ;;  %s161_s30 = int_to_ptr.hbm [resolvable:$true] %s160_s30  ;;  %s179_s27 = int_to_ptr.hbm [resolvable:$true] %s178_s27 }
  0x2f   : > { %s620_s26 = sshra.s32 %s161_s30, 4  ;;  %s621_s26 = int_to_ptr.hbm [resolvable:$true] %s620_s26 }
  0x30   : > { %s622_s8 = scalar_lea.hbm %s621_s26, 1  ;;  %p625_p2 = scmp.lt.s32.totalorder %s621_s26, %s1094_s1 }
  0x31   : > { %p623_p1 = scmp.ne.s32.totalorder %s621_s26, %s622_s8  ;;  %p626_p3 = scmp.lt.s32.totalorder %s973_s13, %s622_s8 }
  0x33   : > { %p627_p4 = por %p626_p3, %p625_p2 }
  0x35   : > { %p628_p7 = pnand %p627_p4, %p623_p1 }
  0x37   : > { %631 = shalt.err (!%p628_p7)  }
  0x38   : > { %165 = dma.hbm_to_vmem [thread:$0]  %s161_s30, 16, %s163_s14, [#allocation3 + $0x1] }
  0x39   : > { %s184_s11 = sadd.s32 3, %s953_s5  ;;  %s644_s15 = sshra.s32 %s179_s27, 4  ;;  %s645_s15 = int_to_ptr.hbm [resolvable:$true] %s644_s15 }
  0x3a   : > { %s646_s0 = scalar_lea.hbm %s645_s15, 1  ;;  %p649_p9 = scmp.lt.s32.totalorder %s645_s15, %s1094_s1 }
  0x3b   : > { %p647_p8 = scmp.ne.s32.totalorder %s645_s15, %s646_s0  ;;  %p650_p10 = scmp.lt.s32.totalorder %s973_s13, %s646_s0 }
  0x3d   : > { %p651_p11 = por %p650_p10, %p649_p9 }
  0x3f   : > { %p652_p12 = pnand %p651_p11, %p647_p8 }
  0x41   : > { %655 = shalt.err (!%p652_p12)  }
  0x42   : > { %183 = dma.hbm_to_vmem [thread:$0]  %s179_s27, 16, %s181_s25, [#allocation3 + $0x2] }
  0x43   : > { %s185_s17 = sld [smem:[#allocation5 + %s184_s11]]  ;;  %s874_s18 = smov [#allocation2 + $0x3]  }
  0x44   : > { %s198_s14 = sshll.u32 %s874_s18, 4  ;;  %s202_s30 = sadd.s32 4, %s953_s5  ;;  %s199_s14 = int_to_ptr.vmem [resolvable:$true] %s198_s14 }
  0x45   : > { %s203_s23 = sld [smem:[#allocation5 + %s202_s30]]  ;;  %s220_s10 = sadd.s32 5, %s953_s5 }
  0x46   : > { %s875_s26 = smov [#allocation2 + $0x4]   ;;  %s221_s12 = sld [smem:[#allocation5 + %s220_s10]] }
  0x47   : > { %s999_s8 = sshll.u32 %s875_s26, 4  ;;  %s876_s27 = smov [#allocation2 + $0x5]  }
  0x48   : > { %1103 = sst [smem:[#allocation37_spill]] %s999_s8  ;;  %s1005_s0 = sshll.u32 %s876_s27, 4  ;;  %s235_s0 = int_to_ptr.vmem [resolvable:$true] %s1005_s0 }
  0x49   : > { %s186_s25 = scalar_lea.hbm %s1094_s1, %s185_s17 }
  0x4a   : > { %s196_s11 = sshll.u32 %s186_s25, 4  ;;  %s197_s11 = int_to_ptr.hbm [resolvable:$true] %s196_s11 }
  0x4b   : > { %s204_s18 = scalar_lea.hbm %s1094_s1, %s203_s23  ;;  %s668_s30 = sshra.s32 %s197_s11, 4  ;;  %s669_s30 = int_to_ptr.hbm [resolvable:$true] %s668_s30 }
  0x4c   : > { %s670_s26 = scalar_lea.hbm %s669_s30, 1  ;;  %p673_p0 = scmp.lt.s32.totalorder %s669_s30, %s1094_s1 }
  0x4d   : > { %p671_p13 = scmp.ne.s32.totalorder %s669_s30, %s670_s26  ;;  %p674_p1 = scmp.lt.s32.totalorder %s973_s13, %s670_s26 }
  0x4f   : > { %p675_p2 = por %p674_p1, %p673_p0 }
  0x51   : > { %p676_p3 = pnand %p675_p2, %p671_p13 }
  0x53   : > { %679 = shalt.err (!%p676_p3)  }
  0x54   : > { %201 = dma.hbm_to_vmem [thread:$0]  %s197_s11, 16, %s199_s14, [#allocation3 + $0x3] }
  0x55   : > { %s214_s17 = sshll.u32 %s204_s18, 4  ;;  %s222_s25 = scalar_lea.hbm %s1094_s1, %s221_s12  ;;  %s215_s17 = int_to_ptr.hbm [resolvable:$true] %s214_s17 }
  0x56   : > { %s232_s23 = sshll.u32 %s222_s25, 4  ;;  %s692_s27 = sshra.s32 %s215_s17, 4  ;;  %s693_s27 = int_to_ptr.hbm [resolvable:$true] %s692_s27  ;;  %s233_s23 = int_to_ptr.hbm [resolvable:$true] %s232_s23 }
  0x57   : > { %s694_s7 = scalar_lea.hbm %s693_s27, 1  ;;  %p697_p7 = scmp.lt.s32.totalorder %s693_s27, %s1094_s1 }
  0x58   : > { %p695_p4 = scmp.ne.s32.totalorder %s693_s27, %s694_s7  ;;  %p698_p8 = scmp.lt.s32.totalorder %s973_s13, %s694_s7 }
  0x5a   : > { %p699_p9 = por %p698_p8, %p697_p7 }
  0x5c   : > { %p700_p10 = pnand %p699_p9, %p695_p4 }
  0x5e   : > { %703 = shalt.err (!%p700_p10)  }
  0x5f   : > { %s1104_s14 = sld [smem:[#allocation37_spill]]  ;;  %s238_s12 = sadd.s32 6, %s953_s5 }
  0x60   : > { %s716_s18 = sshra.s32 %s233_s23, 4  ;;  %s717_s18 = int_to_ptr.hbm [resolvable:$true] %s716_s18 }
  0x61   : > { %s718_s30 = scalar_lea.hbm %s717_s18, 1  ;;  %p721_p12 = scmp.lt.s32.totalorder %s717_s18, %s1094_s1 }
  0x62   : > { %p719_p11 = scmp.ne.s32.totalorder %s717_s18, %s718_s30  ;;  %p722_p13 = scmp.lt.s32.totalorder %s973_s13, %s718_s30 }
  0x64   : > { %p723_p0 = por %p722_p13, %p721_p12 }
  0x65   : > { %s1105_s11 = int_to_ptr.vmem [resolvable:$true] %s1104_s14 }
  0x66   : > { %219 = dma.hbm_to_vmem [thread:$0]  %s215_s17, 16, %s1105_s11, [#allocation3 + $0x4] }
  0x67   : > { %p724_p1 = pnand %p723_p0, %p719_p11 }
  0x69   : > { %727 = shalt.err (!%p724_p1)  }
  0x6a   : > { %237 = dma.hbm_to_vmem [thread:$0]  %s233_s23, 16, %s235_s0, [#allocation3 + $0x5] }
  0x6b   : > { %s239_s9 = sld [smem:[#allocation5 + %s238_s12]]  ;;  %s256_s17 = sadd.s32 7, %s953_s5 }
  0x6c   : > { %s257_s15 = sld [smem:[#allocation5 + %s256_s17]]  ;;  %s877_s25 = smov [#allocation2 + $0x6]  }
  0x6d   : > { %s252_s27 = sshll.u32 %s877_s25, 4  ;;  %s878_s7 = smov [#allocation2 + $0x7]   ;;  %s253_s27 = int_to_ptr.vmem [resolvable:$true] %s252_s27 }
  0x6e   : > { %s1032_s16 = sshll.u32 %s878_s7, 4  ;;  %s271_s16 = int_to_ptr.vmem [resolvable:$true] %s1032_s16 }
  0x71   : > { %s240_s11 = scalar_lea.hbm %s1094_s1, %s239_s9 }
  0x72   : > { %s250_s18 = sshll.u32 %s240_s11, 4  ;;  %s258_s23 = scalar_lea.hbm %s1094_s1, %s257_s15  ;;  %s251_s18 = int_to_ptr.hbm [resolvable:$true] %s250_s18 }
  0x73   : > { %s740_s12 = sshra.s32 %s251_s18, 4  ;;  %s741_s12 = int_to_ptr.hbm [resolvable:$true] %s740_s12 }
  0x74   : > { %s742_s26 = scalar_lea.hbm %s741_s12, 1  ;;  %p745_p3 = scmp.lt.s32.totalorder %s741_s12, %s1094_s1 }
  0x75   : > { %p743_p2 = scmp.ne.s32.totalorder %s741_s12, %s742_s26  ;;  %p746_p4 = scmp.lt.s32.totalorder %s973_s13, %s742_s26 }
  0x77   : > { %p747_p7 = por %p746_p4, %p745_p3 }
  0x79   : > { %p748_p8 = pnand %p747_p7, %p743_p2 }
  0x7b   : > { %751 = shalt.err (!%p748_p8)  }
  0x7c   : > { %255 = dma.hbm_to_vmem [thread:$0]  %s251_s18, 16, %s253_s27, [#allocation3 + $0x6] }
  0x7d   : > { %s268_s9 = sshll.u32 %s258_s23, 4  ;;  %s269_s9 = int_to_ptr.hbm [resolvable:$true] %s268_s9 }
  0x7e   : > { %s764_s25 = sshra.s32 %s269_s9, 4  ;;  %s765_s25 = int_to_ptr.hbm [resolvable:$true] %s764_s25 }
  0x7f   : > { %s766_s7 = scalar_lea.hbm %s765_s25, 1  ;;  %p769_p10 = scmp.lt.s32.totalorder %s765_s25, %s1094_s1 }
  0x80   : > { %p767_p9 = scmp.ne.s32.totalorder %s765_s25, %s766_s7  ;;  %p770_p11 = scmp.lt.s32.totalorder %s973_s13, %s766_s7 }
  0x82   : > { %p771_p12 = por %p770_p11, %p769_p10 }
  0x84   : > { %p772_p13 = pnand %p771_p12, %p767_p9 }
  0x86   : > { %775 = shalt.err (!%p772_p13)  }
  0x87   : > { %273 = dma.hbm_to_vmem [thread:$0]  %s269_s9, 16, %s271_s16, [#allocation3 + $0x7] }
  0x88   : > { %s131_s14 = scalar_lea.vmem [#allocation6], %s957_s6 }
  0x89   : > { %834 = dma.done.wait [#allocation3], 16 }
  0x8a   : > { %835 = vsyncadd [#allocation3], 4294967280 }
  0x8b   : > { %836 = dma.done.wait [#allocation3 + $0x1], 16 }
  0x8c   : > { %837 = vsyncadd [#allocation3 + $0x1], 4294967280 }
  0x8d   : > { %838 = dma.done.wait [#allocation3 + $0x2], 16 }
  0x8e   : > { %839 = vsyncadd [#allocation3 + $0x2], 4294967280 }
  0x8f   : > { %840 = dma.done.wait [#allocation3 + $0x3], 16 }
  0x90   : > { %841 = vsyncadd [#allocation3 + $0x3], 4294967280 }
  0x91   : > { %842 = dma.done.wait [#allocation3 + $0x4], 16 }
  0x92   : > { %843 = vsyncadd [#allocation3 + $0x4], 4294967280 }
  0x93   : > { %844 = dma.done.wait [#allocation3 + $0x5], 16 }
  0x94   : > { %845 = vsyncadd [#allocation3 + $0x5], 4294967280 }
  0x95   : > { %846 = dma.done.wait [#allocation3 + $0x6], 16 }
  0x96   : > { %847 = vsyncadd [#allocation3 + $0x6], 4294967280 }
  0x97   : > { %848 = dma.done.wait [#allocation3 + $0x7], 16 }
  0x98   : > { %849 = vsyncadd [#allocation3 + $0x7], 4294967280  ;;  %v291_v0 = vld [vmem:[#allocation2] sm:$0xff]  ;;  %s336_s18 = scalar_lea.hbm %s1097_s4, %s953_s5  ;;  %s338_s23 = sshll.u32 %s131_s14, 4  ;;  %s339_s23 = int_to_ptr.vmem [resolvable:$true] %s338_s23 }
  0x99   : > { %292 = vadd.xlane.f32.xlu0 %v291_v0  ;;  %v294_v1 = vmul.f32 %v291_v0, %v291_v0  ;;  %v580_v16 = vld [vmem:[%s1095_s2] ss:$0 sm:$0xff]  ;;  %s340_s12 = sshll.u32 %s336_s18, 4  ;;  %s1106_s26 = sand.u32 1, %s860_s20   ;;  %s341_s12 = int_to_ptr.hbm [resolvable:$true] %s340_s12 }
  0x9a   : > { %v581_v19 = vld [vmem:[%s1096_s3] ss:$0 sm:$0xff]  ;;  %s326_s10 = scalar_lea.sflag [#allocation7], %s1106_s26  ;;  %s802_s17 = sshra.s32 %s341_s12, 4  ;;  %s803_s17 = int_to_ptr.hbm [resolvable:$true] %s802_s17 }
  0x9b   : > { %s804_s5 = scalar_lea.hbm %s803_s17, 8  ;;  %s808_s7 = scalar_lea.hbm %s1097_s4, 16 }
  0x9c   : > { %p805_p0 = scmp.ne.s32.totalorder %s803_s17, %s804_s5  ;;  %p809_p3 = scmp.lt.s32.totalorder %s803_s17, %s1097_s4 }
  0x9d   : > { %p810_p4 = scmp.lt.s32.totalorder %s808_s7, %s804_s5 }
  0x9e   : > { %p806_p1 = pnand %p805_p0, %p942_p5 }
  0x9f   : > { %p811_p7 = por %p810_p4, %p809_p3 }
  0xa0   : > { %p807_p2 = pneg %p806_p1 }
  0xa1   : > { %295 = vadd.xlane.f32.xlu0 %v294_v1 }
  0xa2   : > { %p812_p8 = pnand %p811_p7, %p807_p2 }
 0x10c   : > { %v293_v2 = vpop.xlane.xlu0 %292 }
 0x10d   : > { %v297_v3 = vmul.f32 0.0078125, %v293_v2 }
 0x10f   : > { %v299_v5 = vmul.f32 %v297_v3, %v297_v3  ;;  %v312_v15 = vsub.f32 %v291_v0, %v297_v3 }
 0x114   : > { %v296_v4 = vpop.xlane.xlu0 %295 }
 0x115   : > { %v298_v6 = vmul.f32 0.0078125, %v296_v4 }
 0x117   : > { %v300_v7 = vsub.f32 %v298_v6, %v299_v5 }
 0x119   : > { %v301_v8 = vadd.f32 1e-05, %v300_v7 }
 0x11b   : > { %582 = vrsqrt.f32 %v301_v8  ;;  %vm308_vm1 = vweird.f32 %v301_v8 }
 0x121   : > { %v583_v9 = vpop.eup %582 }
 0x122   : > { %v303_v10 = vmul.f32 %v583_v9, %v301_v8  ;;  %vm309_vm0 = vweird.f32 %v583_v9 }
 0x123   : > { %vm310_vm2 = vmor %vm308_vm1, %vm309_vm0 }
 0x124   : > { %v304_v11 = vmul.f32 %v583_v9, %v303_v10 }
 0x126   : > { %v305_v12 = vmul.f32 0.5, %v304_v11 }
 0x128   : > { %v306_v13 = vsub.f32 1.5, %v305_v12 }
 0x12a   : > { %v307_v14 = vmul.f32 %v583_v9, %v306_v13 }
 0x12c   : > { %v311_v17 = vsel %vm310_vm2, %v583_v9, %v307_v14 }
 0x12d   : > { %v313_v18 = vmul.f32 %v312_v15, %v311_v17 }
 0x12f   : > { %v318_v20 = vmul.f32 %v580_v16, %v313_v18 }
 0x131   : > { %v323_v21 = vadd.f32 %v581_v19, %v318_v20 }
 0x133   : > { %324 = vst [vmem:[%s131_s14] sm:$0xff] %v323_v21 }
 0x134   : > { %815 = shalt.err (!%p812_p8)
}
 0x135   : > { %532 = dma.vmem_to_hbm [thread:$0]  (%p942_p5), %s339_s23, 128, %s341_s12, %s326_s10  }
 0x136 PF: > { %p538_p9 = scmp.ge.s32.totalorder %s868_s22, 2  ;;  %s352_s6 = sand.u32 1, %s856_s19  }
 0x137   : > { %s353_s14 = scalar_lea.sflag [#allocation7], %s352_s6 }
 0x138   : > { %p535_p10 = pnand %p538_p9, %p946_p6 }
 0x13a   : > { %p536_p11 = pneg %p535_p10 }
 0x13c   : > { %851 = dma.done.wait (%p536_p11), %s353_s14, 128  }
 0x13d   : > { %853 = vsyncadd (%p536_p11), %s353_s14, 4294967168  ;;  %s1107_s13 = sld [smem:[#allocation36_spill]]  ;;  %p22_p12 = scmp.ge.s32.totalorder %s930_s24, 4  }
 0x13e   : > { %s1108_s19 = smov %s860_s20  ;;  %s1109_s20 = smov %s864_s21 }
 0x13f   : > { %s1111_s22 = smov %s930_s24  ;;  %24 = sbr.rel (!%p22_p12) target bundleno = 9 (0x9), region = 129 }
 0x143   : > { %s1110_s21 = smov %s1107_s13 }
 0x144   :  { %359 = vsyncpa [#allocation7], 1 }
 0x145   :  { %361 = vsyncpa [#allocation7 + $0x1], 1 }
 0x146   :  { %362 = vsyncmov [#allocation3] }
 0x149   :  { %s363_s22 = vpop.sfrf %362 }
 0x14a   :  { %p516_p5 = scmp.ne.s32.totalorder %s363_s22, 0 }
 0x14c   :  { %367 = shalt.err (%p516_p5)  }
 0x14d   :  { %369 = vsyncmov [#allocation3 + $0x1] }
 0x150   :  { %s370_s28 = vpop.sfrf %369 }
 0x151   :  { %p517_p6 = scmp.ne.s32.totalorder %s370_s28, 0 }
 0x153   :  { %374 = shalt.err (%p517_p6)  }
 0x154   :  { %376 = vsyncmov [#allocation3 + $0x2] }
 0x157   :  { %s377_s29 = vpop.sfrf %376 }
 0x158   :  { %p518_p13 = scmp.ne.s32.totalorder %s377_s29, 0 }
 0x15a   :  { %381 = shalt.err (%p518_p13)  }
 0x15b   :  { %383 = vsyncmov [#allocation3 + $0x3] }
 0x15e   :  { %s384_s27 = vpop.sfrf %383 }
 0x15f   :  { %p519_p0 = scmp.ne.s32.totalorder %s384_s27, 0 }
 0x161   :  { %388 = shalt.err (%p519_p0)  }
 0x162   :  { %390 = vsyncmov [#allocation3 + $0x4] }
 0x165   :  { %s391_s24 = vpop.sfrf %390 }
 0x166   :  { %p520_p1 = scmp.ne.s32.totalorder %s391_s24, 0 }
 0x168   :  { %395 = shalt.err (%p520_p1)  }
 0x169   :  { %397 = vsyncmov [#allocation3 + $0x5] }
 0x16c   :  { %s398_s1 = vpop.sfrf %397 }
 0x16d   :  { %p521_p2 = scmp.ne.s32.totalorder %s398_s1, 0 }
 0x16f   :  { %402 = shalt.err (%p521_p2)  }
 0x170   :  { %404 = vsyncmov [#allocation3 + $0x6] }
 0x173   :  { %s405_s2 = vpop.sfrf %404 }
 0x174   :  { %p522_p3 = scmp.ne.s32.totalorder %s405_s2, 0 }
 0x176   :  { %409 = shalt.err (%p522_p3)  }
 0x177   :  { %411 = vsyncmov [#allocation3 + $0x7] }
 0x17a   :  { %s412_s3 = vpop.sfrf %411 }
 0x17b   :  { %p523_p4 = scmp.ne.s32.totalorder %s412_s3, 0 }
 0x17d   :  { %416 = shalt.err (%p523_p4)  }
 0x17e   :  { %418 = vsyncmov [#allocation3 + $0x8] }
 0x181   :  { %s419_s4 = vpop.sfrf %418 }
 0x182   :  { %p524_p7 = scmp.ne.s32.totalorder %s419_s4, 0 }
 0x184   :  { %423 = shalt.err (%p524_p7)  }
 0x185   :  { %425 = vsyncmov [#allocation3 + $0x9] }
 0x188   :  { %s426_s19 = vpop.sfrf %425 }
 0x189   :  { %p525_p8 = scmp.ne.s32.totalorder %s426_s19, 0 }
 0x18b   :  { %430 = shalt.err (%p525_p8)  }
 0x18c   :  { %432 = vsyncmov [#allocation3 + $0xa] }
 0x18f   :  { %s433_s20 = vpop.sfrf %432 }
 0x190   :  { %p526_p9 = scmp.ne.s32.totalorder %s433_s20, 0 }
 0x192   :  { %437 = shalt.err (%p526_p9)  }
 0x193   :  { %439 = vsyncmov [#allocation3 + $0xb] }
 0x196   :  { %s440_s21 = vpop.sfrf %439 }
 0x197   :  { %p527_p10 = scmp.ne.s32.totalorder %s440_s21, 0 }
 0x199   :  { %444 = shalt.err (%p527_p10)  }
 0x19a   :  { %446 = vsyncmov [#allocation3 + $0xc] }
 0x19d   :  { %s447_s16 = vpop.sfrf %446 }
 0x19e   :  { %p528_p11 = scmp.ne.s32.totalorder %s447_s16, 0 }
 0x1a0   :  { %451 = shalt.err (%p528_p11)  }
 0x1a1   :  { %453 = vsyncmov [#allocation3 + $0xd] }
 0x1a4   :  { %s454_s11 = vpop.sfrf %453 }
 0x1a5   :  { %p529_p12 = scmp.ne.s32.totalorder %s454_s11, 0 }
 0x1a7   :  { %458 = shalt.err (%p529_p12)  }
 0x1a8   :  { %460 = vsyncmov [#allocation3 + $0xe] }
 0x1ab   :  { %s461_s18 = vpop.sfrf %460 }
 0x1ac   :  { %p530_p5 = scmp.ne.s32.totalorder %s461_s18, 0 }
 0x1ae   :  { %465 = shalt.err (%p530_p5)  }
 0x1af   :  { %467 = vsyncmov [#allocation3 + $0xf] }
 0x1b2   :  { %s468_s30 = vpop.sfrf %467 }
 0x1b3   :  { %p531_p6 = scmp.ne.s32.totalorder %s468_s30, 0 }
 0x1b5   :  { %472 = shalt.err (%p531_p6)  }

</bundles_post_ra>
